<compile_context>
chip_gen: v7x
topology: tpu7x:2x2x1
jax: 0.10.0
libtpu: 0.0.40
codegen_flags: <defaults>
</compile_context>

<pallas_src>
import functools
import math

import jax
import jax.numpy as jnp
from jax.experimental import pallas as pl
from jax.experimental.pallas import tpu as pltpu


# ----------------------------- Pallas kernel ------------------------------- #
def _decoder_layer_kernel(x_ref, cos_ref, sin_up_ref, sin_dn_ref, bias_ref,
                          wqkv_ref, wo_ref, w13_ref, w2_ref,
                          attn_norm_ref, ffn_norm_ref,
                          o_ref, *, n_heads, n_kv_heads, head_dim, eps):
    f32 = jnp.float32
    bf16 = jnp.bfloat16

    bb, S, D = x_ref.shape
    M = bb * S
    hd = head_dim
    n_rep = n_heads // n_kv_heads
    d_kv = n_kv_heads * hd

    # Fold the batch rows of this block into the matmul M dimension.
    x = x_ref[...].reshape(M, D)                       # (M, D) f32

    def rmsnorm(v, w):
        ms = jnp.mean(v * v, axis=-1, keepdims=True)
        return v * jax.lax.rsqrt(ms + eps) * w

    # ------------------ attention branch ------------------ #
    xn = rmsnorm(x, attn_norm_ref[...]).astype(bf16)
    # Fused QKV projection: (M, D) @ (D, D + 2*d_kv), bf16 in / f32 accumulate.
    # 1/sqrt(head_dim) is already folded into the wq columns.
    qkv = jnp.dot(xn, wqkv_ref[...], preferred_element_type=f32)    # (M, W)

    # RoPE as a pure lane swizzle: the even/odd pair selection and the sign are
    # folded into the precomputed tables, so the rotation is
    #   out = x*cos + roll(x,-1)*sin_up + roll(x,+1)*sin_dn
    # (identity over the v columns: cos=1, sin=0).  Pair (2j, 2j+1) never
    # straddles a segment boundary (all widths even), and the wrapped columns
    # always hit a zero sin entry, so the circular wraparound is harmless.
    up = jnp.roll(qkv, -1, axis=1)                     # up[:, j] = qkv[:, j+1]
    dn = jnp.roll(qkv, 1, axis=1)                      # dn[:, j] = qkv[:, j-1]
    roped = qkv * cos_ref[...] + up * sin_up_ref[...] + dn * sin_dn_ref[...]

    qs = roped[:, :D].astype(bf16)                     # (M, D)
    ks = roped[:, D:D + d_kv].astype(bf16)             # (M, d_kv)
    vs = roped[:, D + d_kv:].astype(bf16)              # (M, d_kv)

    # GQA grouping: one batched matmul per (batch row, kv head) group with
    # M = n_rep*S query rows; K/V are NOT repeated per query head.
    q_g, k_g, v_g = [], [], []
    for b in range(bb):
        qb = qs[b * S:(b + 1) * S, :]                  # aligned sublane slice
        kb = ks[b * S:(b + 1) * S, :]
        vb = vs[b * S:(b + 1) * S, :]
        for g in range(n_kv_heads):
            q_g.append(jnp.concatenate(
                [qb[:, (g * n_rep + r) * hd:(g * n_rep + r + 1) * hd]
                 for r in range(n_rep)], axis=0))      # (n_rep*S, hd)
            k_g.append(kb[:, g * hd:(g + 1) * hd])     # (S, hd)
            v_g.append(vb[:, g * hd:(g + 1) * hd])     # (S, hd)
    q3 = jnp.stack(q_g, axis=0)                        # (G, n_rep*S, hd) bf16
    k3 = jnp.stack(k_g, axis=0)                        # (G, S, hd)      bf16
    v3 = jnp.stack(v_g, axis=0)                        # (G, S, hd)      bf16

    scores = jax.lax.dot_general(q3, k3, (((2,), (2,)), ((0,), (0,))),
                                 preferred_element_type=f32)   # (G, n_rep*S, S)
    scores = scores + bias_ref[...][None, :, :]        # precomputed causal bias
    scores = scores - jnp.max(scores, axis=-1, keepdims=True)
    p = jnp.exp(scores)
    p = p * pl.reciprocal(jnp.sum(p, axis=-1, keepdims=True), approx=True)
    ctx = jax.lax.dot_general(p.astype(bf16), v3, (((2,), (1,)), ((0,), (0,))),
                              preferred_element_type=f32)      # (G, n_rep*S, hd)

    # Scatter the grouped context back to (M, D) row-major / head-major lanes.
    att_rows = []
    for b in range(bb):
        cols = []
        for g in range(n_kv_heads):
            cg = ctx[b * n_kv_heads + g]               # (n_rep*S, hd)
            for r in range(n_rep):
                cols.append(cg[r * S:(r + 1) * S, :])  # aligned sublane slice
        att_rows.append(jnp.concatenate(cols, axis=-1))        # (S, D)
    att = jnp.concatenate(att_rows, axis=0)                    # (M, D) f32

    h_res = x + jnp.dot(att.astype(bf16), wo_ref[...],
                        preferred_element_type=f32)

    # ------------------ feed-forward branch ------------------ #
    hidden = w13_ref.shape[1] // 2                     # padded to lane multiple
    hn = rmsnorm(h_res, ffn_norm_ref[...]).astype(bf16)
    gu = jnp.dot(hn, w13_ref[...], preferred_element_type=f32)  # (M, 2*hidden)
    gated = (jax.nn.silu(gu[:, :hidden]) * gu[:, hidden:]).astype(bf16)
    ff = jnp.dot(gated, w2_ref[...], preferred_element_type=f32)

    o_ref[...] = (h_res + ff).reshape(bb, S, D)


# ------------------------------- wrapper ------------------------------------ #
def decoder_layer(x, freqs_cos, freqs_sin, params, *, n_heads, n_kv_heads,
                  eps=1e-5, batch_block=None):
    B, S, D = x.shape
    assert D % n_heads == 0 and n_heads % n_kv_heads == 0
    head_dim = D // n_heads
    assert head_dim % 2 == 0, "RoPE lane swizzle requires an even head_dim"
    n_rep = n_heads // n_kv_heads
    d_kv = n_kv_heads * head_dim
    f32, bf16 = jnp.float32, jnp.bfloat16

    if batch_block is None:
        # Fold the whole batch into one grid step (optimal for single-TC
        # v5e/v6e).  On v7x pass batch_block=B//2 so the "parallel" grid axis
        # has extent >= 2 and both TensorCores get work.
        batch_block = B
    assert B % batch_block == 0
    BB = batch_block

    # ---- RoPE tables, hoisted out of the kernel (grid-invariant inputs) ----
    # Interleaved-pair layout per head: cos[:, 2j] = cos[:, 2j+1] = cos_j.
    cos_hd = jnp.repeat(freqs_cos.astype(f32), 2, axis=-1)          # (S, hd)
    sin_rep = jnp.repeat(freqs_sin.astype(f32), 2, axis=-1)         # (S, hd)
    even = (jnp.arange(head_dim) % 2 == 0)[None, :]
    sin_up_hd = jnp.where(even, -sin_rep, 0.0)   # multiplies roll(x, -1)
    sin_dn_hd = jnp.where(even, 0.0, sin_rep)    # multiplies roll(x, +1)

    nrope = n_heads + n_kv_heads                 # q heads + k heads get RoPE
    cos_all = jnp.concatenate([jnp.tile(cos_hd, (1, nrope)),
                               jnp.ones((S, d_kv), f32)], axis=-1)
    sin_up_all = jnp.concatenate([jnp.tile(sin_up_hd, (1, nrope)),
                                  jnp.zeros((S, d_kv), f32)], axis=-1)
    sin_dn_all = jnp.concatenate([jnp.tile(sin_dn_hd, (1, nrope)),
                                  jnp.zeros((S, d_kv), f32)], axis=-1)
    # Fused-slab rows are (b, s): replicate the tables per batch row in a block.
    cos_all = jnp.tile(cos_all, (BB, 1))
    sin_up_all = jnp.tile(sin_up_all, (BB, 1))
    sin_dn_all = jnp.tile(sin_dn_all, (BB, 1))

    # ---- causal bias for the GQA-grouped score rows (row m = r*S + s) ----
    qpos = jnp.arange(n_rep * S) % S
    kpos = jnp.arange(S)
    bias = jnp.where(kpos[None, :] <= qpos[:, None], 0.0, -1e30).astype(f32)

    # ---- fused, pre-transposed (in, out) weights ----
    inv_scale = 1.0 / math.sqrt(head_dim)        # folded into wq columns
    wqkv = jnp.concatenate([params["wq"] * inv_scale, params["wk"],
                            params["wv"]], axis=1).astype(bf16)
    # Pad the FFN hidden dim to a multiple of 128 so gate/up slices are
    # lane-aligned; the zero padding contributes exactly 0 to the output.
    hidden = params["w1"].shape[1]
    hidden_pad = ((hidden + 127) // 128) * 128
    pad = hidden_pad - hidden
    w1 = jnp.pad(params["w1"], ((0, 0), (0, pad)))
    w3 = jnp.pad(params["w3"], ((0, 0), (0, pad)))
    w2 = jnp.pad(params["w2"], ((0, pad), (0, 0))).astype(bf16)
    w13 = jnp.concatenate([w1, w3], axis=1).astype(bf16)
    wo = params["wo"].astype(bf16)
    attn_norm = params["attn_norm"].reshape(1, D).astype(f32)
    ffn_norm = params["ffn_norm"].reshape(1, D).astype(f32)

    inputs = (x.astype(f32), cos_all, sin_up_all, sin_dn_all, bias,
              wqkv, wo, w13, w2, attn_norm, ffn_norm)

    in_specs = [pl.BlockSpec((BB, S, D), lambda b: (b, 0, 0))]
    for a in inputs[1:]:
        # Whole-array, grid-invariant blocks (constant index_map).
        in_specs.append(pl.BlockSpec(a.shape, lambda b: (0, 0)))

    kernel = functools.partial(_decoder_layer_kernel, n_heads=n_heads,
                               n_kv_heads=n_kv_heads, head_dim=head_dim,
                               eps=eps)
    return pl.pallas_call(
        kernel,
        out_shape=jax.ShapeDtypeStruct((B, S, D), jnp.float32),
        grid=(B // BB,),
        in_specs=in_specs,
        out_specs=pl.BlockSpec((BB, S, D), lambda b: (b, 0, 0)),
        compiler_params=pltpu.CompilerParams(
            dimension_semantics=("parallel",),
            vmem_limit_bytes=24 * 1024 * 1024),
    )(*inputs)


# --------------------------- pure-JAX reference ------------------------------ #
def reference_forward(x, freqs_cos, freqs_sin, p, *, n_heads, n_kv_heads, eps=1e-5):
    B, S, D = x.shape
    head_dim = D // n_heads
    n_rep = n_heads // n_kv_heads

    def rmsnorm(v, w):
        return v * jax.lax.rsqrt(jnp.mean(v * v, -1, keepdims=True) + eps) * w

    def rope(t, cos, sin):
        tr = t.reshape(t.shape[:-1] + (-1, 2))
        r, i = tr[..., 0], tr[..., 1]
        c = cos[None, :, None, :]
        s = sin[None, :, None, :]
        out_r = r * c - i * s
        out_i = r * s + i * c
        return jnp.stack([out_r, out_i], -1).reshape(t.shape)

    xn = rmsnorm(x, p["attn_norm"])
    q = (xn @ p["wq"]).reshape(B, S, n_heads, head_dim)
    k = (xn @ p["wk"]).reshape(B, S, n_kv_heads, head_dim)
    v = (xn @ p["wv"]).reshape(B, S, n_kv_heads, head_dim)
    q = rope(q, freqs_cos, freqs_sin)
    k = rope(k, freqs_cos, freqs_sin)
    k = jnp.repeat(k, n_rep, axis=2)
    v = jnp.repeat(v, n_rep, axis=2)
    q, k, v = (t.transpose(0, 2, 1, 3) for t in (q, k, v))     # (B, H, S, hd)
    scores = (q @ k.swapaxes(-1, -2)) / math.sqrt(head_dim)
    row = jnp.arange(S)[:, None]
    col = jnp.arange(S)[None, :]
    scores = scores + jnp.where(col <= row, 0.0, -jnp.inf)
    att = jax.nn.softmax(scores, axis=-1) @ v                   # (B, H, S, hd)
    att = att.transpose(0, 2, 1, 3).reshape(B, S, D)
    h = x + att @ p["wo"]
    hn = rmsnorm(h, p["ffn_norm"])
    ff = (jax.nn.silu(hn @ p["w1"]) * (hn @ p["w3"])) @ p["w2"]
    return h + ff


# --------------------------------- main -------------------------------------- #
if __name__ == "__main__":
    # Small but lane-dense config (dim multiple of 128, grouped KV heads).
    B, S = 2, 16
    dim, n_heads, n_kv_heads, multiple_of, eps = 128, 4, 2, 32, 1e-5
    head_dim = dim // n_heads
    d_kv = n_kv_heads * head_dim
    hidden = 4 * dim
    hidden = int(2 * hidden / 3)
    hidden = multiple_of * ((hidden + multiple_of - 1) // multiple_of)   # 352

    key = jax.random.PRNGKey(0)
    kx, kq, kk, kv, ko, k1, k2, k3 = jax.random.split(key, 8)
    scale = 0.05
    params = {
        "wq": scale * jax.random.normal(kq, (dim, dim), jnp.float32),
        "wk": scale * jax.random.normal(kk, (dim, d_kv), jnp.float32),
        "wv": scale * jax.random.normal(kv, (dim, d_kv), jnp.float32),
        "wo": scale * jax.random.normal(ko, (dim, dim), jnp.float32),
        "w1": scale * jax.random.normal(k1, (dim, hidden), jnp.float32),
        "w2": scale * jax.random.normal(k2, (hidden, dim), jnp.float32),
        "w3": scale * jax.random.normal(k3, (dim, hidden), jnp.float32),
        "attn_norm": jnp.ones((dim,), jnp.float32),
        "ffn_norm": jnp.ones((dim,), jnp.float32),
    }

    x = jax.random.normal(kx, (B, S, dim), jnp.float32)

    # precompute_freqs_cis equivalent: (S, head_dim // 2)
    inv_freq = 1.0 / (10000.0 ** (jnp.arange(0, head_dim, 2, dtype=jnp.float32) / head_dim))
    t = jnp.arange(S, dtype=jnp.float32)
    freqs = jnp.outer(t, inv_freq)
    freqs_cos = jnp.cos(freqs)
    freqs_sin = jnp.sin(freqs)

    out = decoder_layer(x, freqs_cos, freqs_sin, params,
                        n_heads=n_heads, n_kv_heads=n_kv_heads, eps=eps)
    out = jax.block_until_ready(out)

    ref = reference_forward(x, freqs_cos, freqs_sin, params,
                            n_heads=n_heads, n_kv_heads=n_kv_heads, eps=eps)
    assert out.shape == (B, S, dim)
    err = float(jnp.max(jnp.abs(out - ref)))
    # bf16 matmul inputs with f32 accumulation (reference is pure f32).
    assert jnp.allclose(out, ref, atol=2e-2, rtol=2e-2), f"max abs err = {err}"
    print("KERNEL_OK")
</pallas_src>

<mosaic_0001>
module attributes {stable_mosaic.version = 11 : i64} {
  func.func @_decoder_layer_kernel(%arg0: i32, %arg1: memref<2x16x128xf32, #tpu.memory_space<vmem>>, %arg2: memref<32x256xf32, #tpu.memory_space<vmem>>, %arg3: memref<32x256xf32, #tpu.memory_space<vmem>>, %arg4: memref<32x256xf32, #tpu.memory_space<vmem>>, %arg5: memref<32x16xf32, #tpu.memory_space<vmem>>, %arg6: memref<128x256xbf16, #tpu.memory_space<vmem>>, %arg7: memref<128x128xbf16, #tpu.memory_space<vmem>>, %arg8: memref<128x768xbf16, #tpu.memory_space<vmem>>, %arg9: memref<384x128xbf16, #tpu.memory_space<vmem>>, %arg10: memref<1x128xf32, #tpu.memory_space<vmem>>, %arg11: memref<1x128xf32, #tpu.memory_space<vmem>>, %arg12: memref<2x16x128xf32, #tpu.memory_space<vmem>>) attributes {dimension_semantics = [#tpu.dimension_semantics<parallel>], iteration_bounds = array<i64: 1>, scalar_prefetch = 0 : i64, scratch_operands = 0 : i64, tpu.core_type = #tpu.core_type<tc>, window_params = [{transform_indices = @transform_0, window_bounds = array<i64: 2, 16, 128>}, {pipeline_mode = #tpu.pipeline_mode<synchronous>, transform_indices = @transform_1, window_bounds = array<i64: 32, 256>}, {pipeline_mode = #tpu.pipeline_mode<synchronous>, transform_indices = @transform_2, window_bounds = array<i64: 32, 256>}, {pipeline_mode = #tpu.pipeline_mode<synchronous>, transform_indices = @transform_3, window_bounds = array<i64: 32, 256>}, {pipeline_mode = #tpu.pipeline_mode<synchronous>, transform_indices = @transform_4, window_bounds = array<i64: 32, 16>}, {pipeline_mode = #tpu.pipeline_mode<synchronous>, transform_indices = @transform_5, window_bounds = array<i64: 128, 256>}, {pipeline_mode = #tpu.pipeline_mode<synchronous>, transform_indices = @transform_6, window_bounds = array<i64: 128, 128>}, {pipeline_mode = #tpu.pipeline_mode<synchronous>, transform_indices = @transform_7, window_bounds = array<i64: 128, 768>}, {pipeline_mode = #tpu.pipeline_mode<synchronous>, transform_indices = @transform_8, window_bounds = array<i64: 384, 128>}, {pipeline_mode = #tpu.pipeline_mode<synchronous>, transform_indices = @transform_9, window_bounds = array<i64: 1, 128>}, {pipeline_mode = #tpu.pipeline_mode<synchronous>, transform_indices = @transform_10, window_bounds = array<i64: 1, 128>}, {transform_indices = @transform_11, window_bounds = array<i64: 2, 16, 128>}]} {
    %c0 = arith.constant 0 : index
    %c0_0 = arith.constant 0 : index
    %c0_1 = arith.constant 0 : index
    %0 = vector.load %arg1[%c0, %c0_0, %c0_1] : memref<2x16x128xf32, #tpu.memory_space<vmem>>, vector<2x16x128xf32>
    %1 = vector.shape_cast %0 : vector<2x16x128xf32> to vector<32x128xf32>
    %c0_2 = arith.constant 0 : index
    %c0_3 = arith.constant 0 : index
    %2 = vector.load %arg10[%c0_2, %c0_3] : memref<1x128xf32, #tpu.memory_space<vmem>>, vector<1x128xf32>
    %3 = arith.mulf %1, %1 : vector<32x128xf32>
    %cst = arith.constant dense<0.000000e+00> : vector<32xf32>
    %4 = vector.multi_reduction <add>, %3, %cst [1] : vector<32x128xf32> to vector<32xf32>
    %5 = vector.shape_cast %4 : vector<32xf32> to vector<32x1xf32>
    %cst_4 = arith.constant 1.280000e+02 : f32
    %6 = vector.broadcast %cst_4 : f32 to vector<32x1xf32>
    %7 = arith.divf %5, %6 : vector<32x1xf32>
    %cst_5 = arith.constant 9.99999974E-6 : f32
    %8 = vector.broadcast %cst_5 : f32 to vector<32x1xf32>
    %9 = arith.addf %7, %8 : vector<32x1xf32>
    %10 = math.rsqrt %9 : vector<32x1xf32>
    %11 = vector.broadcast %10 : vector<32x1xf32> to vector<32x128xf32>
    %12 = arith.mulf %1, %11 : vector<32x128xf32>
    %13 = vector.broadcast %2 : vector<1x128xf32> to vector<32x128xf32>
    %14 = arith.mulf %12, %13 : vector<32x128xf32>
    %15 = arith.truncf %14 : vector<32x128xf32> to vector<32x128xbf16>
    %c0_6 = arith.constant 0 : index
    %c0_7 = arith.constant 0 : index
    %16 = vector.load %arg6[%c0_6, %c0_7] : memref<128x256xbf16, #tpu.memory_space<vmem>>, vector<128x256xbf16>
    %cst_8 = arith.constant dense<0.000000e+00> : vector<32x256xf32>
    %17 = tpu.matmul %15, %16, %cst_8 {dimension_numbers = #tpu.dot_dimension_numbers<[1], [0], [0], [1], [0, 0, 1, 1], [], []>} : vector<32x128xbf16>, vector<128x256xbf16>, vector<32x256xf32> -> vector<32x256xf32>
    %18 = vector.extract_strided_slice %17 {offsets = [0, 1], sizes = [32, 255], strides = [1, 1]} : vector<32x256xf32> to vector<32x255xf32>
    %19 = vector.extract_strided_slice %17 {offsets = [0, 0], sizes = [32, 1], strides = [1, 1]} : vector<32x256xf32> to vector<32x1xf32>
    %20 = tpu.concatenate %18, %19 in 1 : vector<32x255xf32>, vector<32x1xf32> -> vector<32x256xf32>
    %21 = vector.extract_strided_slice %17 {offsets = [0, 255], sizes = [32, 1], strides = [1, 1]} : vector<32x256xf32> to vector<32x1xf32>
    %22 = vector.extract_strided_slice %17 {offsets = [0, 0], sizes = [32, 255], strides = [1, 1]} : vector<32x256xf32> to vector<32x255xf32>
    %23 = tpu.concatenate %21, %22 in 1 : vector<32x1xf32>, vector<32x255xf32> -> vector<32x256xf32>
    %c0_9 = arith.constant 0 : index
    %c0_10 = arith.constant 0 : index
    %24 = vector.load %arg2[%c0_9, %c0_10] : memref<32x256xf32, #tpu.memory_space<vmem>>, vector<32x256xf32>
    %25 = arith.mulf %17, %24 : vector<32x256xf32>
    %c0_11 = arith.constant 0 : index
    %c0_12 = arith.constant 0 : index
    %26 = vector.load %arg3[%c0_11, %c0_12] : memref<32x256xf32, #tpu.memory_space<vmem>>, vector<32x256xf32>
    %27 = arith.mulf %20, %26 : vector<32x256xf32>
    %28 = arith.addf %25, %27 : vector<32x256xf32>
    %c0_13 = arith.constant 0 : index
    %c0_14 = arith.constant 0 : index
    %29 = vector.load %arg4[%c0_13, %c0_14] : memref<32x256xf32, #tpu.memory_space<vmem>>, vector<32x256xf32>
    %30 = arith.mulf %23, %29 : vector<32x256xf32>
    %31 = arith.addf %28, %30 : vector<32x256xf32>
    %32 = vector.extract_strided_slice %31 {offsets = [0, 0], sizes = [32, 128], strides = [1, 1]} : vector<32x256xf32> to vector<32x128xf32>
    %33 = arith.truncf %32 : vector<32x128xf32> to vector<32x128xbf16>
    %34 = vector.extract_strided_slice %31 {offsets = [0, 128], sizes = [32, 64], strides = [1, 1]} : vector<32x256xf32> to vector<32x64xf32>
    %35 = arith.truncf %34 : vector<32x64xf32> to vector<32x64xbf16>
    %36 = vector.extract_strided_slice %31 {offsets = [0, 192], sizes = [32, 64], strides = [1, 1]} : vector<32x256xf32> to vector<32x64xf32>
    %37 = arith.truncf %36 : vector<32x64xf32> to vector<32x64xbf16>
    %38 = vector.extract_strided_slice %33 {offsets = [0, 0], sizes = [16, 128], strides = [1, 1]} : vector<32x128xbf16> to vector<16x128xbf16>
    %39 = vector.extract_strided_slice %35 {offsets = [0, 0], sizes = [16, 64], strides = [1, 1]} : vector<32x64xbf16> to vector<16x64xbf16>
    %40 = vector.extract_strided_slice %37 {offsets = [0, 0], sizes = [16, 64], strides = [1, 1]} : vector<32x64xbf16> to vector<16x64xbf16>
    %41 = vector.extract_strided_slice %38 {offsets = [0, 0], sizes = [16, 32], strides = [1, 1]} : vector<16x128xbf16> to vector<16x32xbf16>
    %42 = vector.extract_strided_slice %38 {offsets = [0, 32], sizes = [16, 32], strides = [1, 1]} : vector<16x128xbf16> to vector<16x32xbf16>
    %43 = tpu.concatenate %41, %42 in 0 : vector<16x32xbf16>, vector<16x32xbf16> -> vector<32x32xbf16>
    %44 = vector.extract_strided_slice %39 {offsets = [0, 0], sizes = [16, 32], strides = [1, 1]} : vector<16x64xbf16> to vector<16x32xbf16>
    %45 = vector.extract_strided_slice %40 {offsets = [0, 0], sizes = [16, 32], strides = [1, 1]} : vector<16x64xbf16> to vector<16x32xbf16>
    %46 = vector.extract_strided_slice %38 {offsets = [0, 64], sizes = [16, 32], strides = [1, 1]} : vector<16x128xbf16> to vector<16x32xbf16>
    %47 = vector.extract_strided_slice %38 {offsets = [0, 96], sizes = [16, 32], strides = [1, 1]} : vector<16x128xbf16> to vector<16x32xbf16>
    %48 = tpu.concatenate %46, %47 in 0 : vector<16x32xbf16>, vector<16x32xbf16> -> vector<32x32xbf16>
    %49 = vector.extract_strided_slice %39 {offsets = [0, 32], sizes = [16, 32], strides = [1, 1]} : vector<16x64xbf16> to vector<16x32xbf16>
    %50 = vector.extract_strided_slice %40 {offsets = [0, 32], sizes = [16, 32], strides = [1, 1]} : vector<16x64xbf16> to vector<16x32xbf16>
    %51 = vector.extract_strided_slice %33 {offsets = [16, 0], sizes = [16, 128], strides = [1, 1]} : vector<32x128xbf16> to vector<16x128xbf16>
    %52 = vector.extract_strided_slice %35 {offsets = [16, 0], sizes = [16, 64], strides = [1, 1]} : vector<32x64xbf16> to vector<16x64xbf16>
    %53 = vector.extract_strided_slice %37 {offsets = [16, 0], sizes = [16, 64], strides = [1, 1]} : vector<32x64xbf16> to vector<16x64xbf16>
    %54 = vector.extract_strided_slice %51 {offsets = [0, 0], sizes = [16, 32], strides = [1, 1]} : vector<16x128xbf16> to vector<16x32xbf16>
    %55 = vector.extract_strided_slice %51 {offsets = [0, 32], sizes = [16, 32], strides = [1, 1]} : vector<16x128xbf16> to vector<16x32xbf16>
    %56 = tpu.concatenate %54, %55 in 0 : vector<16x32xbf16>, vector<16x32xbf16> -> vector<32x32xbf16>
    %57 = vector.extract_strided_slice %52 {offsets = [0, 0], sizes = [16, 32], strides = [1, 1]} : vector<16x64xbf16> to vector<16x32xbf16>
    %58 = vector.extract_strided_slice %53 {offsets = [0, 0], sizes = [16, 32], strides = [1, 1]} : vector<16x64xbf16> to vector<16x32xbf16>
    %59 = vector.extract_strided_slice %51 {offsets = [0, 64], sizes = [16, 32], strides = [1, 1]} : vector<16x128xbf16> to vector<16x32xbf16>
    %60 = vector.extract_strided_slice %51 {offsets = [0, 96], sizes = [16, 32], strides = [1, 1]} : vector<16x128xbf16> to vector<16x32xbf16>
    %61 = tpu.concatenate %59, %60 in 0 : vector<16x32xbf16>, vector<16x32xbf16> -> vector<32x32xbf16>
    %62 = vector.extract_strided_slice %52 {offsets = [0, 32], sizes = [16, 32], strides = [1, 1]} : vector<16x64xbf16> to vector<16x32xbf16>
    %63 = vector.extract_strided_slice %53 {offsets = [0, 32], sizes = [16, 32], strides = [1, 1]} : vector<16x64xbf16> to vector<16x32xbf16>
    %64 = vector.shape_cast %43 : vector<32x32xbf16> to vector<1x32x32xbf16>
    %65 = vector.shape_cast %48 : vector<32x32xbf16> to vector<1x32x32xbf16>
    %66 = vector.shape_cast %56 : vector<32x32xbf16> to vector<1x32x32xbf16>
    %67 = vector.shape_cast %61 : vector<32x32xbf16> to vector<1x32x32xbf16>
    %68 = tpu.concatenate %64, %65, %66, %67 in 0 : vector<1x32x32xbf16>, vector<1x32x32xbf16>, vector<1x32x32xbf16>, vector<1x32x32xbf16> -> vector<4x32x32xbf16>
    %69 = vector.shape_cast %44 : vector<16x32xbf16> to vector<1x16x32xbf16>
    %70 = vector.shape_cast %49 : vector<16x32xbf16> to vector<1x16x32xbf16>
    %71 = vector.shape_cast %57 : vector<16x32xbf16> to vector<1x16x32xbf16>
    %72 = vector.shape_cast %62 : vector<16x32xbf16> to vector<1x16x32xbf16>
    %73 = tpu.concatenate %69, %70, %71, %72 in 0 : vector<1x16x32xbf16>, vector<1x16x32xbf16>, vector<1x16x32xbf16>, vector<1x16x32xbf16> -> vector<4x16x32xbf16>
    %74 = vector.shape_cast %45 : vector<16x32xbf16> to vector<1x16x32xbf16>
    %75 = vector.shape_cast %50 : vector<16x32xbf16> to vector<1x16x32xbf16>
    %76 = vector.shape_cast %58 : vector<16x32xbf16> to vector<1x16x32xbf16>
    %77 = vector.shape_cast %63 : vector<16x32xbf16> to vector<1x16x32xbf16>
    %78 = tpu.concatenate %74, %75, %76, %77 in 0 : vector<1x16x32xbf16>, vector<1x16x32xbf16>, vector<1x16x32xbf16>, vector<1x16x32xbf16> -> vector<4x16x32xbf16>
    %cst_15 = arith.constant dense<0.000000e+00> : vector<4x32x16xf32>
    %79 = tpu.matmul %68, %73, %cst_15 {dimension_numbers = #tpu.dot_dimension_numbers<[2], [2], [1], [1], [0, 0, 0, 1, 1, 1], [0], [0]>} : vector<4x32x32xbf16>, vector<4x16x32xbf16>, vector<4x32x16xf32> -> vector<4x32x16xf32>
    %c0_16 = arith.constant 0 : index
    %c0_17 = arith.constant 0 : index
    %80 = vector.load %arg5[%c0_16, %c0_17] : memref<32x16xf32, #tpu.memory_space<vmem>>, vector<32x16xf32>
    %81 = vector.shape_cast %80 : vector<32x16xf32> to vector<1x32x16xf32>
    %82 = vector.broadcast %81 : vector<1x32x16xf32> to vector<4x32x16xf32>
    %83 = arith.addf %79, %82 : vector<4x32x16xf32>
    %cst_18 = arith.constant dense<0xFF800000> : vector<4x32xf32>
    %84 = vector.multi_reduction <maximumf>, %83, %cst_18 [2] : vector<4x32x16xf32> to vector<4x32xf32>
    %85 = vector.shape_cast %84 : vector<4x32xf32> to vector<4x32x1xf32>
    %86 = vector.broadcast %85 : vector<4x32x1xf32> to vector<4x32x16xf32>
    %87 = arith.subf %83, %86 : vector<4x32x16xf32>
    %88 = math.exp %87 : vector<4x32x16xf32>
    %cst_19 = arith.constant dense<0.000000e+00> : vector<4x32xf32>
    %89 = vector.multi_reduction <add>, %88, %cst_19 [2] : vector<4x32x16xf32> to vector<4x32xf32>
    %90 = vector.shape_cast %89 : vector<4x32xf32> to vector<4x32x1xf32>
    %91 = tpu.reciprocal %90 {approx = true} : vector<4x32x1xf32> -> vector<4x32x1xf32>
    %92 = vector.broadcast %91 : vector<4x32x1xf32> to vector<4x32x16xf32>
    %93 = arith.mulf %88, %92 : vector<4x32x16xf32>
    %94 = arith.truncf %93 : vector<4x32x16xf32> to vector<4x32x16xbf16>
    %cst_20 = arith.constant dense<0.000000e+00> : vector<4x32x32xf32>
    %95 = tpu.matmul %94, %78, %cst_20 {dimension_numbers = #tpu.dot_dimension_numbers<[2], [1], [1], [2], [0, 0, 0, 1, 1, 2], [0], [0]>} : vector<4x32x16xbf16>, vector<4x16x32xbf16>, vector<4x32x32xf32> -> vector<4x32x32xf32>
    %96 = vector.extract_strided_slice %95 {offsets = [0, 0, 0], sizes = [1, 32, 32], strides = [1, 1, 1]} : vector<4x32x32xf32> to vector<1x32x32xf32>
    %97 = vector.shape_cast %96 : vector<1x32x32xf32> to vector<32x32xf32>
    %98 = vector.extract_strided_slice %97 {offsets = [0, 0], sizes = [16, 32], strides = [1, 1]} : vector<32x32xf32> to vector<16x32xf32>
    %99 = vector.extract_strided_slice %97 {offsets = [16, 0], sizes = [16, 32], strides = [1, 1]} : vector<32x32xf32> to vector<16x32xf32>
    %100 = vector.extract_strided_slice %95 {offsets = [1, 0, 0], sizes = [1, 32, 32], strides = [1, 1, 1]} : vector<4x32x32xf32> to vector<1x32x32xf32>
    %101 = vector.shape_cast %100 : vector<1x32x32xf32> to vector<32x32xf32>
    %102 = vector.extract_strided_slice %101 {offsets = [0, 0], sizes = [16, 32], strides = [1, 1]} : vector<32x32xf32> to vector<16x32xf32>
    %103 = vector.extract_strided_slice %101 {offsets = [16, 0], sizes = [16, 32], strides = [1, 1]} : vector<32x32xf32> to vector<16x32xf32>
    %104 = tpu.concatenate %98, %99, %102, %103 in 1 : vector<16x32xf32>, vector<16x32xf32>, vector<16x32xf32>, vector<16x32xf32> -> vector<16x128xf32>
    %105 = vector.extract_strided_slice %95 {offsets = [2, 0, 0], sizes = [1, 32, 32], strides = [1, 1, 1]} : vector<4x32x32xf32> to vector<1x32x32xf32>
    %106 = vector.shape_cast %105 : vector<1x32x32xf32> to vector<32x32xf32>
    %107 = vector.extract_strided_slice %106 {offsets = [0, 0], sizes = [16, 32], strides = [1, 1]} : vector<32x32xf32> to vector<16x32xf32>
    %108 = vector.extract_strided_slice %106 {offsets = [16, 0], sizes = [16, 32], strides = [1, 1]} : vector<32x32xf32> to vector<16x32xf32>
    %109 = vector.extract_strided_slice %95 {offsets = [3, 0, 0], sizes = [1, 32, 32], strides = [1, 1, 1]} : vector<4x32x32xf32> to vector<1x32x32xf32>
    %110 = vector.shape_cast %109 : vector<1x32x32xf32> to vector<32x32xf32>
    %111 = vector.extract_strided_slice %110 {offsets = [0, 0], sizes = [16, 32], strides = [1, 1]} : vector<32x32xf32> to vector<16x32xf32>
    %112 = vector.extract_strided_slice %110 {offsets = [16, 0], sizes = [16, 32], strides = [1, 1]} : vector<32x32xf32> to vector<16x32xf32>
    %113 = tpu.concatenate %107, %108, %111, %112 in 1 : vector<16x32xf32>, vector<16x32xf32>, vector<16x32xf32>, vector<16x32xf32> -> vector<16x128xf32>
    %114 = tpu.concatenate %104, %113 in 0 : vector<16x128xf32>, vector<16x128xf32> -> vector<32x128xf32>
    %115 = arith.truncf %114 : vector<32x128xf32> to vector<32x128xbf16>
    %c0_21 = arith.constant 0 : index
    %c0_22 = arith.constant 0 : index
    %116 = vector.load %arg7[%c0_21, %c0_22] : memref<128x128xbf16, #tpu.memory_space<vmem>>, vector<128x128xbf16>
    %cst_23 = arith.constant dense<0.000000e+00> : vector<32x128xf32>
    %117 = tpu.matmul %115, %116, %cst_23 {dimension_numbers = #tpu.dot_dimension_numbers<[1], [0], [0], [1], [0, 0, 1, 1], [], []>} : vector<32x128xbf16>, vector<128x128xbf16>, vector<32x128xf32> -> vector<32x128xf32>
    %118 = arith.addf %1, %117 : vector<32x128xf32>
    %c0_24 = arith.constant 0 : index
    %c0_25 = arith.constant 0 : index
    %119 = vector.load %arg11[%c0_24, %c0_25] : memref<1x128xf32, #tpu.memory_space<vmem>>, vector<1x128xf32>
    %120 = arith.mulf %118, %118 : vector<32x128xf32>
    %cst_26 = arith.constant dense<0.000000e+00> : vector<32xf32>
    %121 = vector.multi_reduction <add>, %120, %cst_26 [1] : vector<32x128xf32> to vector<32xf32>
    %122 = vector.shape_cast %121 : vector<32xf32> to vector<32x1xf32>
    %cst_27 = arith.constant 1.280000e+02 : f32
    %123 = vector.broadcast %cst_27 : f32 to vector<32x1xf32>
    %124 = arith.divf %122, %123 : vector<32x1xf32>
    %cst_28 = arith.constant 9.99999974E-6 : f32
    %125 = vector.broadcast %cst_28 : f32 to vector<32x1xf32>
    %126 = arith.addf %124, %125 : vector<32x1xf32>
    %127 = math.rsqrt %126 : vector<32x1xf32>
    %128 = vector.broadcast %127 : vector<32x1xf32> to vector<32x128xf32>
    %129 = arith.mulf %118, %128 : vector<32x128xf32>
    %130 = vector.broadcast %119 : vector<1x128xf32> to vector<32x128xf32>
    %131 = arith.mulf %129, %130 : vector<32x128xf32>
    %132 = arith.truncf %131 : vector<32x128xf32> to vector<32x128xbf16>
    %c0_29 = arith.constant 0 : index
    %c0_30 = arith.constant 0 : index
    %133 = vector.load %arg8[%c0_29, %c0_30] : memref<128x768xbf16, #tpu.memory_space<vmem>>, vector<128x768xbf16>
    %cst_31 = arith.constant dense<0.000000e+00> : vector<32x768xf32>
    %134 = tpu.matmul %132, %133, %cst_31 {dimension_numbers = #tpu.dot_dimension_numbers<[1], [0], [0], [1], [0, 0, 1, 1], [], []>} : vector<32x128xbf16>, vector<128x768xbf16>, vector<32x768xf32> -> vector<32x768xf32>
    %135 = vector.extract_strided_slice %134 {offsets = [0, 0], sizes = [32, 384], strides = [1, 1]} : vector<32x768xf32> to vector<32x384xf32>
    %136 = arith.negf %135 : vector<32x384xf32>
    %137 = math.exp %136 : vector<32x384xf32>
    %cst_32 = arith.constant 1.000000e+00 : f32
    %138 = vector.broadcast %cst_32 : f32 to vector<32x384xf32>
    %139 = arith.addf %138, %137 : vector<32x384xf32>
    %140 = arith.divf %138, %139 : vector<32x384xf32>
    %141 = arith.mulf %135, %140 : vector<32x384xf32>
    %142 = vector.extract_strided_slice %134 {offsets = [0, 384], sizes = [32, 384], strides = [1, 1]} : vector<32x768xf32> to vector<32x384xf32>
    %143 = arith.mulf %141, %142 : vector<32x384xf32>
    %144 = arith.truncf %143 : vector<32x384xf32> to vector<32x384xbf16>
    %c0_33 = arith.constant 0 : index
    %c0_34 = arith.constant 0 : index
    %145 = vector.load %arg9[%c0_33, %c0_34] : memref<384x128xbf16, #tpu.memory_space<vmem>>, vector<384x128xbf16>
    %cst_35 = arith.constant dense<0.000000e+00> : vector<32x128xf32>
    %146 = tpu.matmul %144, %145, %cst_35 {dimension_numbers = #tpu.dot_dimension_numbers<[1], [0], [0], [1], [0, 0, 1, 1], [], []>} : vector<32x384xbf16>, vector<384x128xbf16>, vector<32x128xf32> -> vector<32x128xf32>
    %147 = arith.addf %118, %146 : vector<32x128xf32>
    %148 = vector.shape_cast %147 : vector<32x128xf32> to vector<2x16x128xf32>
    %c0_36 = arith.constant 0 : index
    %c0_37 = arith.constant 0 : index
    %c0_38 = arith.constant 0 : index
    %149 = vector.load %arg12[%c0_36, %c0_37, %c0_38] : memref<2x16x128xf32, #tpu.memory_space<vmem>>, vector<2x16x128xf32>
    tpu.vector_store %arg12[%c0_36, %c0_37, %c0_38], %148 {strides = array<i32>} : memref<2x16x128xf32, #tpu.memory_space<vmem>>, vector<2x16x128xf32>,
    return
  }
  func.func @transform_0(%arg0: i32) -> (i32, i32, i32) {
    %c0_i32 = arith.constant 0 : i32
    %c0_i32_0 = arith.constant 0 : i32
    %c0_i32_1 = arith.constant 0 : i32
    return %arg0, %c0_i32, %c0_i32_0 : i32, i32, i32
  }
  func.func @transform_1(%arg0: i32) -> (i32, i32) {
    %c0_i32 = arith.constant 0 : i32
    %c0_i32_0 = arith.constant 0 : i32
    %c0_i32_1 = arith.constant 0 : i32
    return %c0_i32, %c0_i32_0 : i32, i32
  }
  func.func @transform_2(%arg0: i32) -> (i32, i32) {
    %c0_i32 = arith.constant 0 : i32
    %c0_i32_0 = arith.constant 0 : i32
    %c0_i32_1 = arith.constant 0 : i32
    return %c0_i32, %c0_i32_0 : i32, i32
  }
  func.func @transform_3(%arg0: i32) -> (i32, i32) {
    %c0_i32 = arith.constant 0 : i32
    %c0_i32_0 = arith.constant 0 : i32
    %c0_i32_1 = arith.constant 0 : i32
    return %c0_i32, %c0_i32_0 : i32, i32
  }
  func.func @transform_4(%arg0: i32) -> (i32, i32) {
    %c0_i32 = arith.constant 0 : i32
    %c0_i32_0 = arith.constant 0 : i32
    %c0_i32_1 = arith.constant 0 : i32
    return %c0_i32, %c0_i32_0 : i32, i32
  }
  func.func @transform_5(%arg0: i32) -> (i32, i32) {
    %c0_i32 = arith.constant 0 : i32
    %c0_i32_0 = arith.constant 0 : i32
    %c0_i32_1 = arith.constant 0 : i32
    return %c0_i32, %c0_i32_0 : i32, i32
  }
  func.func @transform_6(%arg0: i32) -> (i32, i32) {
    %c0_i32 = arith.constant 0 : i32
    %c0_i32_0 = arith.constant 0 : i32
    %c0_i32_1 = arith.constant 0 : i32
    return %c0_i32, %c0_i32_0 : i32, i32
  }
  func.func @transform_7(%arg0: i32) -> (i32, i32) {
    %c0_i32 = arith.constant 0 : i32
    %c0_i32_0 = arith.constant 0 : i32
    %c0_i32_1 = arith.constant 0 : i32
    return %c0_i32, %c0_i32_0 : i32, i32
  }
  func.func @transform_8(%arg0: i32) -> (i32, i32) {
    %c0_i32 = arith.constant 0 : i32
    %c0_i32_0 = arith.constant 0 : i32
    %c0_i32_1 = arith.constant 0 : i32
    return %c0_i32, %c0_i32_0 : i32, i32
  }
  func.func @transform_9(%arg0: i32) -> (i32, i32) {
    %c0_i32 = arith.constant 0 : i32
    %c0_i32_0 = arith.constant 0 : i32
    %c0_i32_1 = arith.constant 0 : i32
    return %c0_i32, %c0_i32_0 : i32, i32
  }
  func.func @transform_10(%arg0: i32) -> (i32, i32) {
    %c0_i32 = arith.constant 0 : i32
    %c0_i32_0 = arith.constant 0 : i32
    %c0_i32_1 = arith.constant 0 : i32
    return %c0_i32, %c0_i32_0 : i32, i32
  }
  func.func @transform_11(%arg0: i32) -> (i32, i32, i32) {
    %c0_i32 = arith.constant 0 : i32
    %c0_i32_0 = arith.constant 0 : i32
    %c0_i32_1 = arith.constant 0 : i32
    return %arg0, %c0_i32, %c0_i32_0 : i32, i32, i32
  }
}

</mosaic_0001>

<bundles_post_ra>
// kernel: tpu_custom_call.1
= control target key start
LH: loop header
LB: loop body
LE: loop exit
PB: predicated region body
PF: predicated region fallthrough
CT: control target
= control target key end

     0   :  { %16 = vsyncpa [#allocation3], 0  ;;  %s3667_s0 = inlined_call_operand.hbm [shape: f32[2,16,128], index: 0, kind: input, shape index: {}]   ;;  %s3668_s1 = inlined_call_operand.hbm [shape: f32[32,256], index: 1, kind: input, shape index: {}]   ;;  %s3669_s2 = inlined_call_operand.hbm [shape: f32[32,256], index: 2, kind: input, shape index: {}]   ;;  %s3670_s3 = inlined_call_operand.hbm [shape: f32[32,256], index: 3, kind: input, shape index: {}]   ;;  %s3671_s4 = inlined_call_operand.vmem [shape: f32[32,16], index: 4, kind: input, shape index: {}]   ;;  %s3672_s5 = inlined_call_operand.hbm [shape: bf16[128,256], index: 5, kind: input, shape index: {}]   ;;  %s3673_s6 = inlined_call_operand.vmem [shape: bf16[128,128], index: 6, kind: input, shape index: {}]   ;;  %s3674_s7 = inlined_call_operand.hbm [shape: bf16[128,768], index: 7, kind: input, shape index: {}]   ;;  %s3675_s8 = inlined_call_operand.hbm [shape: bf16[384,128], index: 8, kind: input, shape index: {}]   ;;  %s3676_s9 = inlined_call_operand.vmem [shape: f32[1,128], index: 9, kind: input, shape index: {}]   ;;  %s3677_s10 = inlined_call_operand.vmem [shape: f32[1,128], index: 10, kind: input, shape index: {}]   ;;  %s3678_s11 = inlined_call_operand.hbm [shape: f32[2,16,128], index: 11, kind: output, shape index: {}]  }
   0x1   :  { %17 = vsyncpa [#allocation6], 0 }
   0x2   :  { %18 = vsyncpa [#allocation9], 0 }
   0x3   :  { %19 = vsyncpa [#allocation12], 0 }
   0x4   :  { %20 = vsyncpa [#allocation4], 0  ;;  %s3030_s17 = smov [#allocation5]   ;;  %s2844_s21 = scalar_lea.hbm %s3668_s1, 1024 }
   0x5   :  { %s38_s18 = sshll.u32 %s3030_s17, 4  ;;  %p2845_p0 = scmp.ne.s32.totalorder %s3668_s1, %s2844_s21  ;;  %s39_s18 = int_to_ptr.vmem [resolvable:$true] %s38_s18 }
   0x6   :  { %p2848_p1 = scmp.lt.u32.totalorder %s2844_s21, %s3668_s1 }
   0x8   :  { %p2850_p2 = pnand %p2848_p1, %p2845_p0 }
   0xa   :  { %2853 = shalt.err (!%p2850_p2)
}
   0xb   :  { %s2854_s26 = scalar_lea.vmem %s39_s18, 1024  ;;  %p2859_p4 = scmp.lt.s32.totalorder %s39_s18, %s39_s18 }
   0xc   :  { %p2855_p3 = scmp.ne.s32.totalorder %s39_s18, %s2854_s26  ;;  %p2860_p5 = scmp.lt.s32.totalorder %s2854_s26, %s2854_s26 }
   0xe   :  { %p2861_p6 = por %p2860_p5, %p2859_p4 }
  0x10   :  { %p2862_p7 = pnand %p2861_p6, %p2855_p3 }
  0x12   :  { %2865 = shalt.err (!%p2862_p7)
}
  0x13   :  { %s3031_s27 = smov 256   ;;  %s3032_s28 = smov 16  }
  0x14   :  { %44 = dma.hbm_to_vmem [thread:$0]  %s3668_s1, 1024, %s39_s18, [#allocation6], %s3031_s27, %s3031_s27, %s3032_s28  }
  0x15   :  { %s3033_s12 = smov [#allocation8]   ;;  %s3034_s14 = smov [#allocation11]  }
  0x16   :  { %s62_s13 = sshll.u32 %s3033_s12, 4  ;;  %s90_s15 = sshll.u32 %s3034_s14, 4  ;;  %s63_s13 = int_to_ptr.vmem [resolvable:$true] %s62_s13  ;;  %s91_s15 = int_to_ptr.vmem [resolvable:$true] %s90_s15 }
  0x17   :  { %s2866_s19 = scalar_lea.hbm %s3670_s3, 1024 }
  0x18   :  { %p2867_p8 = scmp.ne.s32.totalorder %s3670_s3, %s2866_s19  ;;  %p2870_p9 = scmp.lt.u32.totalorder %s2866_s19, %s3670_s3 }
  0x1a   :  { %p2872_p10 = pnand %p2870_p9, %p2867_p8 }
  0x1c   :  { %2875 = shalt.err (!%p2872_p10)
}
  0x1d   :  { %s2876_s1 = scalar_lea.vmem %s63_s13, 1024  ;;  %p2881_p12 = scmp.lt.s32.totalorder %s63_s13, %s63_s13 }
  0x1e   :  { %p2877_p11 = scmp.ne.s32.totalorder %s63_s13, %s2876_s1  ;;  %p2882_p13 = scmp.lt.s32.totalorder %s2876_s1, %s2876_s1 }
  0x20   :  { %p2883_p0 = por %p2882_p13, %p2881_p12 }
  0x22   :  { %p2884_p1 = pnand %p2883_p0, %p2877_p11 }
  0x24   :  { %2887 = shalt.err (!%p2884_p1)
}
  0x25   :  { %68 = dma.hbm_to_vmem [thread:$0]  %s3670_s3, 1024, %s63_s13, [#allocation9], %s3031_s27, %s3031_s27, %s3032_s28  }
  0x26   :  { %s2888_s29 = scalar_lea.hbm %s3674_s7, 6144 }
  0x27   :  { %p2889_p2 = scmp.ne.s32.totalorder %s3674_s7, %s2888_s29  ;;  %p2892_p3 = scmp.lt.u32.totalorder %s2888_s29, %s3674_s7 }
  0x29   :  { %p2894_p4 = pnand %p2892_p3, %p2889_p2 }
  0x2b   :  { %2897 = shalt.err (!%p2894_p4)
}
  0x2c   :  { %s2898_s17 = scalar_lea.vmem %s91_s15, 6144  ;;  %p2903_p6 = scmp.lt.s32.totalorder %s91_s15, %s91_s15 }
  0x2d   :  { %p2899_p5 = scmp.ne.s32.totalorder %s91_s15, %s2898_s17  ;;  %p2904_p7 = scmp.lt.s32.totalorder %s2898_s17, %s2898_s17 }
  0x2f   :  { %p2905_p8 = por %p2904_p7, %p2903_p6 }
  0x31   :  { %p2906_p9 = pnand %p2905_p8, %p2899_p5 }
  0x33   :  { %2909 = shalt.err (!%p2906_p9)
}
  0x34   :  { %s3035_s3 = smov 384   ;;  %s3036_s13 = smov 24  }
  0x35   :  { %96 = dma.hbm_to_vmem [thread:$0]  %s3674_s7, 6144, %s91_s15, [#allocation12], %s3035_s3, %s3035_s3, %s3036_s13  }
  0x36   :  { %s3037_s21 = smov [#allocation2]   ;;  %s2910_s18 = scalar_lea.hbm %s3667_s0, 512 }
  0x37   :  { %s26_s22 = sshll.u32 %s3037_s21, 4  ;;  %p2911_p10 = scmp.ne.s32.totalorder %s3667_s0, %s2910_s18  ;;  %s27_s22 = int_to_ptr.vmem [resolvable:$true] %s26_s22 }
  0x38   :  { %p2914_p11 = scmp.lt.u32.totalorder %s2910_s18, %s3667_s0 }
  0x3a   :  { %p2916_p12 = pnand %p2914_p11, %p2911_p10 }
  0x3c   :  { %2919 = shalt.err (!%p2916_p12)
}
  0x3d   :  { %s2920_s30 = scalar_lea.vmem %s27_s22, 512  ;;  %p2925_p0 = scmp.lt.s32.totalorder %s27_s22, %s27_s22 }
  0x3e   :  { %p2921_p13 = scmp.ne.s32.totalorder %s27_s22, %s2920_s30  ;;  %p2926_p1 = scmp.lt.s32.totalorder %s2920_s30, %s2920_s30 }
  0x40   :  { %p2927_p2 = por %p2926_p1, %p2925_p0 }
  0x42   :  { %p2928_p3 = pnand %p2927_p2, %p2921_p13 }
  0x44   :  { %2931 = shalt.err (!%p2928_p3)
}
  0x45   :  { %s3038_s7 = smov 128   ;;  %s3039_s15 = smov 8  }
  0x46   :  { %32 = dma.hbm_to_vmem [thread:$0]  %s3667_s0, 512, %s27_s22, [#allocation3], %s3038_s7, %s3038_s7, %s3039_s15  }
  0x47   :  { %s3040_s16 = smov [#allocation7]   ;;  %s3041_s3 = smov [#allocation10]  }
  0x48   :  { %s50_s17 = sshll.u32 %s3040_s16, 4  ;;  %s76_s13 = sshll.u32 %s3041_s3, 4  ;;  %s51_s17 = int_to_ptr.vmem [resolvable:$true] %s50_s17  ;;  %s3168_s13 = int_to_ptr.vmem [resolvable:$true] %s76_s13 }
  0x49   :  { %s2932_s21 = scalar_lea.hbm %s3669_s2, 1024 }
  0x4a   :  { %p2933_p4 = scmp.ne.s32.totalorder %s3669_s2, %s2932_s21  ;;  %p2936_p5 = scmp.lt.u32.totalorder %s2932_s21, %s3669_s2 }
  0x4c   :  { %p2938_p6 = pnand %p2936_p5, %p2933_p4 }
  0x4e   :  { %2941 = shalt.err (!%p2938_p6)
}
  0x4f   :  { %s2942_s0 = scalar_lea.vmem %s51_s17, 1024  ;;  %p2947_p8 = scmp.lt.s32.totalorder %s51_s17, %s51_s17 }
  0x50   :  { %p2943_p7 = scmp.ne.s32.totalorder %s51_s17, %s2942_s0  ;;  %p2948_p9 = scmp.lt.s32.totalorder %s2942_s0, %s2942_s0 }
  0x52   :  { %p2949_p10 = por %p2948_p9, %p2947_p8 }
  0x54   :  { %p2950_p11 = pnand %p2949_p10, %p2943_p7 }
  0x56   :  { %2953 = shalt.err (!%p2950_p11)
}
  0x57   :  { %56 = dma.hbm_to_vmem [thread:$0]  %s3669_s2, 1024, %s51_s17, [#allocation6], %s3031_s27, %s3031_s27, %s3032_s28  }
  0x58   :  { %s2954_s30 = scalar_lea.hbm %s3672_s5, 2048 }
  0x59   :  { %p2955_p12 = scmp.ne.s32.totalorder %s3672_s5, %s2954_s30  ;;  %p2958_p13 = scmp.lt.u32.totalorder %s2954_s30, %s3672_s5 }
  0x5b   :  { %p2960_p0 = pnand %p2958_p13, %p2955_p12 }
  0x5d   :  { %2963 = shalt.err (!%p2960_p0)
}
  0x5e   :  { %s2964_s19 = scalar_lea.vmem %s3168_s13, 2048  ;;  %p2969_p2 = scmp.lt.s32.totalorder %s3168_s13, %s3168_s13 }
  0x5f   :  { %p2965_p1 = scmp.ne.s32.totalorder %s3168_s13, %s2964_s19  ;;  %p2970_p3 = scmp.lt.s32.totalorder %s2964_s19, %s2964_s19 }
  0x61   :  { %p2971_p4 = por %p2970_p3, %p2969_p2 }
  0x63   :  { %p2972_p5 = pnand %p2971_p4, %p2965_p1 }
  0x65   :  { %2975 = shalt.err (!%p2972_p5)
}
  0x66   :  { %82 = dma.hbm_to_vmem [thread:$0]  %s3672_s5, 2048, %s3168_s13, [#allocation9], %s3038_s7, %s3038_s7, %s3039_s15  }
  0x67   :  { %s3042_s28 = smov [#allocation13]   ;;  %s2976_s23 = scalar_lea.hbm %s3675_s8, 3072 }
  0x68   :  { %s102_s17 = sshll.u32 %s3042_s28, 4  ;;  %p2977_p6 = scmp.ne.s32.totalorder %s3675_s8, %s2976_s23  ;;  %s103_s17 = int_to_ptr.vmem [resolvable:$true] %s102_s17 }
  0x69   :  { %p2980_p7 = scmp.lt.u32.totalorder %s2976_s23, %s3675_s8 }
  0x6b   :  { %p2982_p8 = pnand %p2980_p7, %p2977_p6 }
  0x6d   :  { %2985 = shalt.err (!%p2982_p8)
}
  0x6e   :  { %s2986_s22 = scalar_lea.vmem %s103_s17, 3072  ;;  %p2991_p10 = scmp.lt.s32.totalorder %s103_s17, %s103_s17 }
  0x6f   :  { %p2987_p9 = scmp.ne.s32.totalorder %s103_s17, %s2986_s22  ;;  %p2992_p11 = scmp.lt.s32.totalorder %s2986_s22, %s2986_s22 }
  0x71   :  { %p2993_p12 = por %p2992_p11, %p2991_p10 }
  0x73   :  { %p2994_p13 = pnand %p2993_p12, %p2987_p9 }
  0x75   :  { %2997 = shalt.err (!%p2994_p13)
}
  0x76   :  { %s3043_s5 = smov 64   ;;  %s3044_s13 = smov 4  }
  0x77   :  { %108 = dma.hbm_to_vmem [thread:$0]  %s3675_s8, 3072, %s103_s17, [#allocation12], %s3043_s5, %s3043_s5, %s3044_s13  }
  0x78   :  { %3020 = dma.done.wait [#allocation3], 512  }
  0x79   :  { %3021 = vsyncadd [#allocation3], 4294966784 }
  0x7a   :  { %3022 = dma.done.wait [#allocation6], 2048  }
  0x7b   :  { %3023 = vsyncadd [#allocation6], 4294965248 }
  0x7c   :  { %3024 = dma.done.wait [#allocation9], 3072  }
  0x7d   :  { %3025 = vsyncadd [#allocation9], 4294964224 }
  0x7e   :  { %3026 = dma.done.wait [#allocation12], 9216  }
  0x7f   :  { %3027 = vsyncadd [#allocation12], 4294958080  ;;  %v3219_v0 = vld [vmem:[#allocation2] sm:$0xff]  ;;  %v3221_v1 = vld [vmem:[#allocation2 + $0x8] sm:$0xff]  ;;  %v3045_v21 = vmov 0   ;;  %s3046_s30 = smov 127  }
  0x80   :  { %v3223_v2 = vld [vmem:[#allocation2 + $0x10] sm:$0xff]  ;;  %v140_v3 = vmul.f32 %v3219_v0, %v3219_v0  ;;  %v3229_v5 = vld [vmem:[#allocation2 + $0x18] sm:$0xff]  ;;  %v2584_v6 = vld [vmem:[#allocation10 + $0x4] ss:$8 sps:$4 sm:$0xff]   ;;  %v141_v8 = vmul.f32 %v3221_v1, %v3221_v1  ;;  %309 = vmatprep.mubr.bf16.mxu0 %v3045_v21  ;;  %vm354_vm0 = vcmask 1039360   ;;  %vm395_vm1 = vcmask 7168  }
  0x81   :  { %v142_v4 = vmul.f32 %v3223_v2, %v3223_v2  ;;  %v2586_v7 = vld [vmem:[#allocation10] ss:$8 sps:$4 sm:$0xff]   ;;  %v143_v9 = vmul.f32 %v3229_v5, %v3229_v5  ;;  %v2587_v10 = vld [vmem:[#allocation10 + $0x14] ss:$8 sps:$4 sm:$0xff]   ;;  %v2589_v11 = vld [vmem:[#allocation10 + $0x10] ss:$8 sps:$4 sm:$0xff]   ;;  %277 = vmatprep.subr.bf16.mxu0 %v2584_v6 }
  0x82   :  { %144 = vadd.xlane.f32.xlu0 %v140_v3  ;;  %278 = vmatpush1.bf16.msra.mxu0 %v2586_v7  ;;  %v2590_v12 = vld [vmem:[#allocation10 + $0x24] ss:$8 sps:$4 sm:$0xff]   ;;  %v2592_v13 = vld [vmem:[#allocation10 + $0x20] ss:$8 sps:$4 sm:$0xff]   ;;  %v2593_v14 = vld [vmem:[#allocation10 + $0x34] ss:$8 sps:$4 sm:$0xff]  }
  0x83   :  { %148 = vadd.xlane.f32.xlu1 %v142_v4  ;;  %279 = vmatprep.subr.bf16.mxu0 %v2587_v10  ;;  %v2595_v15 = vld [vmem:[#allocation10 + $0x30] ss:$8 sps:$4 sm:$0xff]   ;;  %v2596_v16 = vld [vmem:[#allocation10 + $0x44] ss:$8 sps:$4 sm:$0xff]   ;;  %v2598_v17 = vld [vmem:[#allocation10 + $0x40] ss:$8 sps:$4 sm:$0xff]  }
  0x84   :  { %v2599_v18 = vld [vmem:[#allocation10 + $0x54] ss:$8 sps:$4 sm:$0xff]   ;;  %v2601_v19 = vld [vmem:[#allocation10 + $0x50] ss:$8 sps:$4 sm:$0xff]   ;;  %v2602_v20 = vld [vmem:[#allocation10 + $0x64] ss:$8 sps:$4 sm:$0xff]  }
  0x85   :  { %v2604_v22 = vld [vmem:[#allocation10 + $0x60] ss:$8 sps:$4 sm:$0xff]   ;;  %v2605_v23 = vld [vmem:[#allocation10 + $0x74] ss:$8 sps:$4 sm:$0xff]   ;;  %v2607_v24 = vld [vmem:[#allocation10 + $0x70] ss:$8 sps:$4 sm:$0xff]  }
  0x86   :  { %146 = vadd.xlane.f32.xlu0 %v141_v8  ;;  %280 = vmatpush1.bf16.msra.mxu0 %v2589_v11  ;;  %v2243_v41 = vld [vmem:[%s3676_s9] ss:$0 sm:$0xff]  ;;  %s3047_s9 = smov 1   ;;  %v429_v3 = vld [vmem:[#allocation7 + $0x8] sm:$0xff]  ;;  %v430_v7 = vld [vmem:[#allocation7 + $0x10] sm:$0xff]  ;;  %vm504_vm2 = vcmask 261120  }
  0x87   :  { %150 = vadd.xlane.f32.xlu1 %v143_v9  ;;  %281 = vmatprep.subr.bf16.mxu0 %v2590_v12  ;;  %v431_v8 = vld [vmem:[#allocation7 + $0x18] sm:$0xff]  ;;  %v412_v9 = vld [vmem:[#allocation5] sm:$0xff]  ;;  %v413_v10 = vld [vmem:[#allocation5 + $0x8] sm:$0xff]  ;;  %s3048_s12 = smov 96   ;;  %vm737_vm3 = vcmask 130048   ;;  %s3049_s1 = smov 32  }
  0x88   :  { %v414_v11 = vld [vmem:[#allocation5 + $0x10] sm:$0xff]  ;;  %vm1180_vm4 = vcmask 523264   ;;  %vm1183_vm5 = vcmask 785408  }
  0x8a   :  { %282 = vmatpush1.bf16.msra.mxu0 %v2592_v13 }
  0x8b   :  { %283 = vmatprep.subr.bf16.mxu0 %v2593_v14 }
  0x8e   :  { %284 = vmatpush1.bf16.msra.mxu0 %v2595_v15  ;;  %v415_v15 = vld [vmem:[#allocation5 + $0x18] sm:$0xff] }
  0x8f   :  { %285 = vmatprep.subr.bf16.mxu0 %v2596_v16  ;;  %v452_v16 = vld [vmem:[#allocation8] sm:$0xff] }
  0x92   :  { %286 = vmatpush1.bf16.msra.mxu0 %v2598_v17  ;;  %v453_v17 = vld [vmem:[#allocation8 + $0x8] sm:$0xff] }
  0x93   :  { %287 = vmatprep.subr.bf16.mxu0 %v2599_v18 }
  0x96   :  { %288 = vmatpush1.bf16.msra.mxu0 %v2601_v19 }
  0x97   :  { %289 = vmatprep.subr.bf16.mxu0 %v2602_v20 }
  0x9a   :  { %290 = vmatpush1.bf16.msra.mxu0 %v2604_v22 }
  0x9b   :  { %291 = vmatprep.subr.bf16.mxu0 %v2605_v23 }
  0x9e   :  { %292 = vmatpush1.bf16.msra.mxu0 %v2607_v24 }
 0x10f   :  { %v145_v25 = vpop.xlane.xlu0 %144 }
 0x110   :  { %v149_v26 = vpop.xlane.xlu1 %148  ;;  %v153_v27 = vmul.f32 0.0078125, %v145_v25 }
 0x111   :  { %v155_v28 = vmul.f32 0.0078125, %v149_v26 }
 0x112   :  { %v157_v29 = vadd.f32 1e-05, %v153_v27 }
 0x113   :  { %v147_v30 = vpop.xlane.xlu0 %146  ;;  %v159_v31 = vadd.f32 1e-05, %v155_v28  ;;  %v454_v28 = vld [vmem:[#allocation8 + $0x10] sm:$0xff] }
 0x114   :  { %v151_v32 = vpop.xlane.xlu1 %150  ;;  %2712 = vrsqrt.f32 %v157_v29  ;;  %v154_v33 = vmul.f32 0.0078125, %v147_v30  ;;  %v455_v29 = vld [vmem:[#allocation8 + $0x18] sm:$0xff] }
 0x115   :  { %v156_v34 = vmul.f32 0.0078125, %v151_v32  ;;  %2714 = vrsqrt.f32 %v159_v31 }
 0x116   :  { %v158_v35 = vadd.f32 1e-05, %v154_v33 }
 0x117   :  { %v160_v36 = vadd.f32 1e-05, %v156_v34 }
 0x118   :  { %2716 = vrsqrt.f32 %v158_v35 }
 0x119   :  { %2718 = vrsqrt.f32 %v160_v36 }
 0x11e   :  { %v2713_v37 = vpop.eup %2712 }
 0x11f   :  { %v2715_v38 = vpop.eup %2714  ;;  %v165_v39 = vmul.f32 %v2713_v37, %v3219_v0 }
 0x120   :  { %v167_v46 = vmul.f32 %v2715_v38, %v3223_v2  ;;  %v428_v2 = vld [vmem:[#allocation7] sm:$0xff] }
 0x121   :  { %v175_v44 = vmul.f32 %v2243_v41, %v165_v39 }
 0x122   :  { %v2717_v40 = vpop.eup %2716  ;;  %v177_v49 = vmul.f32 %v2243_v41, %v167_v46 }
 0x123   :  { %v2719_v42 = vpop.eup %2718  ;;  %v166_v43 = vmul.f32 %v2717_v40, %v3221_v1 }
 0x124   :  { %v168_v47 = vmul.f32 %v2719_v42, %v3229_v5 }
 0x125   :  { %v176_v45 = vmul.f32 %v2243_v41, %v166_v43 }
 0x126   :  { %v178_v50 = vmul.f32 %v2243_v41, %v168_v47 }
 0x127   :  { %v179_v48 = vpack.c.bf16 %v176_v45, %v175_v44 }
 0x128   :  { %v180_v51 = vpack.c.bf16 %v178_v50, %v177_v49 }
 0x129   :  { %310 = vmatmul.mubr.bf16.vlgmr.msra.gmra.mrb[0].mxu0 %v179_v48 }
 0x12a   :  { %319 = vmatprep.mubr.bf16.mxu0 %v3045_v21 }
 0x131   :  { %320 = vmatmul.mubr.bf16.gmra.mrb[4].mxu0 %v180_v51 }
 0x1fc   :  { %v311_v52 = vpop.f32.mrb[0].mxu0 }
 0x1fd   :  { %338 = vrot.lane.b32.xlu0 %v311_v52, %s3046_s30  ;;  %v313_v53 = vpop.f32.mrb[1].mxu0  ;;  %v420_v25 = vmul.f32 %v412_v9, %v311_v52  ;;  %v456_v9 = vld [vmem:[#allocation8 + $0x20] sm:$0xff] }
 0x1fe   :  { %340 = vrot.lane.b32.xlu1 %v313_v53, %s3046_s30  ;;  %v315_v54 = vpop.f32.mrb[2].mxu0  ;;  %v421_v26 = vmul.f32 %v413_v10, %v313_v53  ;;  %v457_v10 = vld [vmem:[#allocation8 + $0x28] sm:$0xff] }
 0x1ff   :  { %v317_v55 = vpop.f32.mrb[3].mxu0  ;;  %v422_v30 = vmul.f32 %v414_v11, %v315_v54 }
 0x200   :  { %v423_v31 = vmul.f32 %v415_v15, %v317_v55 }
 0x201   :  { %387 = vrot.lane.b32.xlu0 %v311_v52, %s3047_s9  ;;  %v432_v52 = vld [vmem:[#allocation7 + $0x20] sm:$0xff] }
 0x202   :  { %342 = vrot.lane.b32.xlu1 %v315_v54, %s3046_s30 }
 0x204   :  { %v3244_v56 = vpop.f32.mrb[4].mxu0 }
 0x205   :  { %375 = vrot.lane.b32.xlu0 %v313_v53, %s3047_s9  ;;  %v3246_v57 = vpop.f32.mrb[5].mxu0  ;;  %v433_v53 = vld [vmem:[#allocation7 + $0x28] sm:$0xff] }
 0x206   :  { %389 = vrot.lane.b32.xlu1 %v315_v54, %s3047_s9  ;;  %v3248_v58 = vpop.f32.mrb[6].mxu0 }
 0x207   :  { %v3250_v59 = vpop.f32.mrb[7].mxu0 }
 0x209   :  { %346 = vrot.lane.b32.xlu0 %v3244_v56, %s3046_s30 }
 0x20a   :  { %344 = vrot.lane.b32.xlu1 %v317_v55, %s3046_s30 }
 0x20d   :  { %379 = vrot.lane.b32.xlu0 %v3246_v57, %s3047_s9 }
 0x20e   :  { %377 = vrot.lane.b32.xlu1 %v317_v55, %s3047_s9 }
 0x211   :  { %350 = vrot.lane.b32.xlu0 %v3248_v58, %s3046_s30 }
 0x212   :  { %348 = vrot.lane.b32.xlu1 %v3246_v57, %s3046_s30 }
 0x215   :  { %391 = vrot.lane.b32.xlu0 %v3244_v56, %s3047_s9 }
 0x216   :  { %352 = vrot.lane.b32.xlu1 %v3250_v59, %s3046_s30 }
 0x21a   :  { %381 = vrot.lane.b32.xlu1 %v3250_v59, %s3047_s9 }
 0x21e   :  { %393 = vrot.lane.b32.xlu1 %v3248_v58, %s3047_s9 }
 0x26f   :  { %v339_v60 = vpop.permute.xlu0 %338 }
 0x270   :  { %v341_v61 = vpop.permute.xlu1 %340 }
 0x271   :  { %v355_v4 = vsel %vm354_vm0, %v339_v60, %v341_v61  ;;  %v371_v5 = vsel %vm354_vm0, %v341_v61, %v339_v60  ;;  %v416_v61 = vld [vmem:[#allocation5 + $0x20] sm:$0xff] }
 0x272   :  { %v436_v12 = vmul.f32 %v428_v2, %v355_v4  ;;  %v437_v13 = vmul.f32 %v429_v3, %v371_v5  ;;  %v418_v4 = vld [vmem:[#allocation5 + $0x30] sm:$0xff]  ;;  %v419_v5 = vld [vmem:[#allocation5 + $0x38] sm:$0xff] }
 0x273   :  { %v388_v62 = vpop.permute.xlu0 %387 }
 0x274   :  { %v343_v63 = vpop.permute.xlu1 %342  ;;  %v444_v35 = vadd.f32 %v436_v12, %v420_v25  ;;  %v445_v36 = vadd.f32 %v437_v13, %v421_v26  ;;  %v424_v13 = vmul.f32 %v416_v61, %v3244_v56 }
 0x277   :  { %v376_v0 = vpop.permute.xlu0 %375 }
 0x278   :  { %v390_v1 = vpop.permute.xlu1 %389  ;;  %v396_v18 = vsel %vm395_vm1, %v388_v62, %v376_v0  ;;  %v408_v19 = vsel %vm395_vm1, %v376_v0, %v388_v62  ;;  %v434_v0 = vld [vmem:[#allocation7 + $0x30] sm:$0xff] }
 0x279   :  { %v460_v32 = vmul.f32 %v452_v16, %v408_v19  ;;  %v461_v33 = vmul.f32 %v453_v17, %v396_v18  ;;  %v426_v17 = vmul.f32 %v418_v4, %v3248_v58  ;;  %v427_v18 = vmul.f32 %v419_v5, %v3250_v59  ;;  %v458_v19 = vld [vmem:[#allocation8 + $0x30] sm:$0xff] }
 0x27b   :  { %v347_v6 = vpop.permute.xlu0 %346  ;;  %v468_v43 = vadd.f32 %v460_v32, %v444_v35  ;;  %v469_v44 = vadd.f32 %v461_v33, %v445_v36 }
 0x27c   :  { %v345_v14 = vpop.permute.xlu1 %344 }
 0x27d   :  { %v356_v20 = vsel %vm354_vm0, %v343_v63, %v345_v14  ;;  %v372_v22 = vsel %vm354_vm0, %v345_v14, %v343_v63  ;;  %v417_v63 = vld [vmem:[#allocation5 + $0x28] sm:$0xff] }
 0x27e   :  { %v438_v23 = vmul.f32 %v430_v7, %v356_v20  ;;  %v439_v24 = vmul.f32 %v431_v8, %v372_v22  ;;  %v425_v14 = vmul.f32 %v417_v63, %v3246_v57  ;;  %v459_v20 = vld [vmem:[#allocation8 + $0x38] sm:$0xff] }
 0x27f   :  { %v380_v27 = vpop.permute.xlu0 %379 }
 0x280   :  { %v378_v34 = vpop.permute.xlu1 %377  ;;  %v446_v39 = vadd.f32 %v438_v23, %v422_v30  ;;  %v447_v40 = vadd.f32 %v439_v24, %v423_v31 }
 0x281   :  { %v397_v37 = vsel %vm395_vm1, %v390_v1, %v378_v34  ;;  %v409_v38 = vsel %vm395_vm1, %v378_v34, %v390_v1  ;;  %v435_v1 = vld [vmem:[#allocation7 + $0x38] sm:$0xff] }
 0x282   :  { %v462_v41 = vmul.f32 %v454_v28, %v409_v38  ;;  %v463_v42 = vmul.f32 %v455_v29, %v397_v37 }
 0x283   :  { %v351_v47 = vpop.permute.xlu0 %350 }
 0x284   :  { %v470_v45 = vadd.f32 %v462_v41, %v446_v39  ;;  %v471_v46 = vadd.f32 %v463_v42, %v447_v40  ;;  %v349_v48 = vpop.permute.xlu1 %348 }
 0x285   :  { %v357_v54 = vsel %vm354_vm0, %v347_v6, %v349_v48  ;;  %v373_v55 = vsel %vm354_vm0, %v349_v48, %v347_v6  ;;  %v500_v48 = vld [vmem:[%s3671_s4] sm:$0xff] }
 0x286   :  { %v3268_v49 = vpack.c.bf16 %v471_v46, %v469_v44  ;;  %v476_v50 = vpack.c.bf16 %v470_v45, %v468_v43  ;;  %v440_v6 = vmul.f32 %v432_v52, %v357_v54  ;;  %v441_v7 = vmul.f32 %v433_v53, %v373_v55  ;;  %v502_v46 = vld [vmem:[%s3671_s4 + $0x10] sm:$0xff]  ;;  %v501_v54 = vld [vmem:[%s3671_s4 + $0x8] sm:$0xff] }
 0x287   :  { %v392_v62 = vpop.permute.xlu0 %391 }
 0x288   :  { %2529 = vmatprep.subr.msk.bf16.mxu1 %vm504_vm2, %v3268_v49  ;;  %v353_v51 = vpop.permute.xlu1 %352  ;;  %2443 = vmatprep.mubr.msk.bf16.mxu1 %vm504_vm2, %v476_v50  ;;  %v512_v60 = vsel %vm504_vm2, %v3268_v49, 0  ;;  %v398_v11 = vsel %vm395_vm1, %v392_v62, %v380_v27  ;;  %v410_v12 = vsel %vm395_vm1, %v380_v27, %v392_v62  ;;  %v448_v22 = vadd.f32 %v440_v6, %v424_v13 }
 0x289   :  { %481 = vrot.lane.b32.xlu0 %v476_v50, %s3048_s12  ;;  %2442 = vmatpush3.bf16.xpose.msra.mxu1 %v512_v60  ;;  %v358_v2 = vsel %vm354_vm0, %v351_v47, %v353_v51  ;;  %v374_v3 = vsel %vm354_vm0, %v353_v51, %v351_v47  ;;  %v449_v23 = vadd.f32 %v441_v7, %v425_v14 }
 0x28a   :  { %v442_v15 = vmul.f32 %v434_v0, %v358_v2  ;;  %v443_v16 = vmul.f32 %v435_v1, %v374_v3  ;;  %v464_v24 = vmul.f32 %v456_v9, %v410_v12  ;;  %v465_v25 = vmul.f32 %v457_v10, %v398_v11 }
 0x28c   :  { %v382_v8 = vpop.permute.xlu1 %381  ;;  %v450_v56 = vadd.f32 %v442_v15, %v426_v17  ;;  %v451_v29 = vadd.f32 %v443_v16, %v427_v18  ;;  %v472_v31 = vadd.f32 %v464_v24, %v448_v22  ;;  %v473_v32 = vadd.f32 %v465_v25, %v449_v23 }
 0x28d   :  { %495 = vrot.lane.b32.xlu0 %v3268_v49, %s3048_s12 }
 0x290   :  { %v394_v26 = vpop.permute.xlu1 %393 }
 0x291   :  { %v399_v27 = vsel %vm395_vm1, %v394_v26, %v382_v8  ;;  %v411_v28 = vsel %vm395_vm1, %v382_v8, %v394_v26 }
 0x292   :  { %v466_v57 = vmul.f32 %v458_v19, %v411_v28  ;;  %v467_v30 = vmul.f32 %v459_v20, %v399_v27 }
 0x294   :  { %v474_v58 = vadd.f32 %v466_v57, %v450_v56  ;;  %v475_v33 = vadd.f32 %v467_v30, %v451_v29 }
 0x296   :  { %v3290_v59 = vpack.c.bf16 %v475_v33, %v473_v32  ;;  %v477_v34 = vpack.c.bf16 %v474_v58, %v472_v31 }
 0x298   :  { %484 = vrot.lane.b32.xlu1 %v477_v34, %s3048_s12  ;;  %v628_v41 = vsel %vm504_vm2, %v3290_v59, 0 }
 0x29c   :  { %486 = vrot.lane.b32.xlu1 %v476_v50, %s3043_s5  ;;  %v503_v50 = vld [vmem:[%s3671_s4 + $0x18] sm:$0xff] }
 0x2a0   :  { %498 = vrot.lane.b32.xlu1 %v3290_v59, %s3048_s12 }
 0x2fb   :  { %v482_v35 = vpop.permute.xlu0 %481 }
 0x2fc   :  { %2444 = vmatmul.mubr.msk.bf16.vlgmr.msra.gmra.mrb[0].mxu1 %vm504_vm2, %v482_v35  ;;  %488 = vrot.lane.b32.xlu0 %v482_v35, %s3043_s5 }
 0x2ff   :  { %v3298_v36 = vpop.permute.xlu0 %495 }
 0x300   :  { %2530 = vmatprep.subr.msk.bf16.mxu1 %vm504_vm2, %v3298_v36  ;;  %490 = vrot.lane.b32.xlu0 %v477_v34, %s3043_s5  ;;  %v570_v37 = vsel %vm504_vm2, %v3298_v36, 0 }
 0x301   :  { %2448 = vmatpush3.bf16.xpose.msra.mxu1 %v570_v37 }
 0x302   :  { %2531 = vmatprep.subr.msk.bf16.mxu1 %vm504_vm2, %v3290_v59 }
 0x30a   :  { %v485_v38 = vpop.permute.xlu1 %484 }
 0x30b   :  { %492 = vrot.lane.b32.xlu1 %v485_v38, %s3043_s5 }
 0x30e   :  { %v487_v39 = vpop.permute.xlu1 %486 }
 0x30f   :  { %2449 = vmatprep.mubr.msk.bf16.mxu1 %vm504_vm2, %v487_v39 }
 0x312   :  { %v3312_v42 = vpop.permute.xlu1 %498 }
 0x313   :  { %v686_v44 = vsel %vm504_vm2, %v3312_v42, 0 }
 0x36e   :  { %v489_v40 = vpop.permute.xlu0 %488 }
 0x36f   :  { %2450 = vmatmul.mubr.msk.bf16.vlgmr.msra.gmra.mrb[4].mxu1 %vm504_vm2, %v489_v40 }
 0x370   :  { %2454 = vmatpush3.bf16.xpose.msra.mxu1 %v628_v41  ;;  %2455 = vmatprep.mubr.msk.bf16.mxu1 %vm504_vm2, %v477_v34 }
 0x371   :  { %2532 = vmatprep.subr.msk.bf16.mxu1 %vm504_vm2, %v3312_v42 }
 0x372   :  { %v491_v43 = vpop.permute.xlu0 %490 }
 0x377   :  { %2456 = vmatmul.mubr.msk.bf16.vlgmr.msra.gmra.mrb[8].mxu1 %vm504_vm2, %v485_v38 }
 0x378   :  { %2460 = vmatpush3.bf16.xpose.msra.mxu1 %v686_v44  ;;  %2461 = vmatprep.mubr.msk.bf16.mxu1 %vm504_vm2, %v491_v43 }
 0x37d   :  { %v493_v45 = vpop.permute.xlu1 %492 }
 0x37f   :  { %2462 = vmatmul.mubr.msk.bf16.vlgmr.msra.gmra.mrb[12].mxu1 %vm504_vm2, %v493_v45 }
 0x3cf   :  { %v2445_v47 = vpop.f32.mrb[0].mxu1 }
 0x3d0   :  { %v3331_v51 = vadd.f32 %v2445_v47, %v502_v46  ;;  %v548_v52 = vpop.f32.mrb[1].mxu1 }
 0x3d1   :  { %v2446_v53 = vpop.f32.mrb[2].mxu1  ;;  %v3336_v55 = vadd.f32 %v548_v52, %v500_v48 }
 0x3d2   :  { %v3338_v60 = vadd.f32 %v2446_v53, %v503_v50  ;;  %v551_v61 = vpop.f32.mrb[3].mxu1  ;;  %v744_v62 = vsel %vm737_vm3, %v3331_v51, -inf }
 0x3d3   :  { %745 = vmax.xlane.f32.xlu0 %v744_v62  ;;  %v3342_v63 = vadd.f32 %v551_v61, %v501_v54  ;;  %v738_v1 = vsel %vm737_vm3, %v3336_v55, -inf }
 0x3d4   :  { %v747_v0 = vsel %vm737_vm3, %v3338_v60, -inf }
 0x3d5   :  { %748 = vmax.xlane.f32.xlu1 %v747_v0  ;;  %v741_v2 = vsel %vm737_vm3, %v3342_v63, -inf }
 0x3d7   :  { %739 = vmax.xlane.f32.xlu0 %v738_v1 }
 0x3d9   :  { %742 = vmax.xlane.f32.xlu1 %v741_v2 }
 0x442   :  { %v2451_v3 = vpop.f32.mrb[4].mxu1 }
 0x443   :  { %v3350_v4 = vadd.f32 %v2451_v3, %v502_v46  ;;  %v606_v5 = vpop.f32.mrb[5].mxu1 }
 0x444   :  { %v2452_v6 = vpop.f32.mrb[6].mxu1  ;;  %v3352_v7 = vadd.f32 %v606_v5, %v500_v48 }
 0x445   :  { %v3354_v8 = vadd.f32 %v2452_v6, %v503_v50  ;;  %v609_v9 = vpop.f32.mrb[7].mxu1  ;;  %v756_v10 = vsel %vm737_vm3, %v3350_v4, -inf }
 0x446   :  { %757 = vmax.xlane.f32.xlu0 %v756_v10  ;;  %v3360_v12 = vadd.f32 %v609_v9, %v501_v54  ;;  %v750_v13 = vsel %vm737_vm3, %v3352_v7, -inf }
 0x447   :  { %v759_v11 = vsel %vm737_vm3, %v3354_v8, -inf }
 0x448   :  { %760 = vmax.xlane.f32.xlu1 %v759_v11  ;;  %v753_v20 = vsel %vm737_vm3, %v3360_v12, -inf }
 0x44a   :  { %751 = vmax.xlane.f32.xlu0 %v750_v13  ;;  %v2457_v14 = vpop.f32.mrb[8].mxu1 }
 0x44b   :  { %v664_v15 = vpop.f32.mrb[9].mxu1  ;;  %v3364_v17 = vadd.f32 %v2457_v14, %v502_v46 }
 0x44c   :  { %v2458_v16 = vpop.f32.mrb[10].mxu1  ;;  %v3374_v24 = vadd.f32 %v664_v15, %v500_v48 }
 0x44d   :  { %v3366_v18 = vadd.f32 %v2458_v16, %v503_v50  ;;  %v667_v19 = vpop.f32.mrb[11].mxu1  ;;  %v768_v25 = vsel %vm737_vm3, %v3364_v17, -inf }
 0x44e   :  { %754 = vmax.xlane.f32.xlu0 %v753_v20  ;;  %v3370_v22 = vadd.f32 %v667_v19, %v501_v54  ;;  %v762_v31 = vsel %vm737_vm3, %v3374_v24, -inf }
 0x44f   :  { %v771_v23 = vsel %vm737_vm3, %v3366_v18, -inf }
 0x450   :  { %772 = vmax.xlane.f32.xlu1 %v771_v23  ;;  %v765_v28 = vsel %vm737_vm3, %v3370_v22, -inf }
 0x452   :  { %769 = vmax.xlane.f32.xlu0 %v768_v25  ;;  %v2463_v26 = vpop.f32.mrb[12].mxu1 }
 0x453   :  { %v722_v27 = vpop.f32.mrb[13].mxu1  ;;  %v3390_v33 = vadd.f32 %v2463_v26, %v502_v46 }
 0x454   :  { %v2464_v56 = vpop.f32.mrb[14].mxu1  ;;  %766 = vmax.xlane.f32.xlu1 %v765_v28  ;;  %v3380_v29 = vadd.f32 %v722_v27, %v500_v48 }
 0x455   :  { %v3382_v57 = vadd.f32 %v2464_v56, %v503_v50  ;;  %v725_v30 = vpop.f32.mrb[15].mxu1  ;;  %v780_v37 = vsel %vm737_vm3, %v3390_v33, -inf }
 0x456   :  { %763 = vmax.xlane.f32.xlu0 %v762_v31  ;;  %v3386_v32 = vadd.f32 %v725_v30, %v501_v54  ;;  %v774_v34 = vsel %vm737_vm3, %v3380_v29, -inf }
 0x457   :  { %v783_v58 = vsel %vm737_vm3, %v3382_v57, -inf }
 0x458   :  { %784 = vmax.xlane.f32.xlu1 %v783_v58  ;;  %v777_v35 = vsel %vm737_vm3, %v3386_v32, -inf }
 0x45a   :  { %775 = vmax.xlane.f32.xlu0 %v774_v34 }
 0x45c   :  { %778 = vmax.xlane.f32.xlu1 %v777_v35 }
 0x45e   :  { %781 = vmax.xlane.f32.xlu0 %v780_v37 }
 0x460   :  { %v746_v38 = vpop.xlane.xlu0 %745 }
 0x461   :  { %v788_v39 = vsub.f32 %v3331_v51, %v746_v38 }
 0x462   :  { %v749_v40 = vpop.xlane.xlu1 %748 }
 0x463   :  { %v806_v41 = vmul.f32 1.442695, %v788_v39  ;;  %v789_v43 = vsub.f32 %v3338_v60, %v749_v40 }
 0x464   :  { %v740_v44 = vpop.xlane.xlu0 %739 }
 0x465   :  { %2720 = vpow2.f32 %v806_v41  ;;  %v808_v45 = vmul.f32 1.442695, %v789_v43  ;;  %v786_v46 = vsub.f32 %v3336_v55, %v740_v44 }
 0x466   :  { %v743_v47 = vpop.xlane.xlu1 %742 }
 0x467   :  { %2722 = vpow2.f32 %v808_v45  ;;  %v802_v48 = vmul.f32 1.442695, %v786_v46  ;;  %v787_v50 = vsub.f32 %v3342_v63, %v743_v47 }
 0x469   :  { %2724 = vpow2.f32 %v802_v48  ;;  %v804_v52 = vmul.f32 1.442695, %v787_v50 }
 0x46b   :  { %2726 = vpow2.f32 %v804_v52 }
 0x46f   :  { %v3402_v53 = vpop.eup %2720 }
 0x470   :  { %v840_v51 = vsel %vm737_vm3, %v3402_v53, 0.0 }
 0x471   :  { %v3406_v54 = vpop.eup %2722  ;;  %841 = vadd.xlane.f32.xlu0 %v840_v51 }
 0x472   :  { %v843_v60 = vsel %vm737_vm3, %v3406_v54, 0.0 }
 0x473   :  { %v3410_v55 = vpop.eup %2724  ;;  %844 = vadd.xlane.f32.xlu1 %v843_v60 }
 0x474   :  { %v834_v61 = vsel %vm737_vm3, %v3410_v55, 0.0 }
 0x475   :  { %v3414_v62 = vpop.eup %2726  ;;  %835 = vadd.xlane.f32.xlu0 %v834_v61 }
 0x476   :  { %v837_v63 = vsel %vm737_vm3, %v3414_v62, 0.0 }
 0x477   :  { %838 = vadd.xlane.f32.xlu1 %v837_v63 }
 0x4d3   :  { %v758_v0 = vpop.xlane.xlu0 %757 }
 0x4d4   :  { %v792_v1 = vsub.f32 %v3350_v4, %v758_v0 }
 0x4d5   :  { %v761_v2 = vpop.xlane.xlu1 %760 }
 0x4d6   :  { %v814_v3 = vmul.f32 1.442695, %v792_v1  ;;  %v793_v5 = vsub.f32 %v3354_v8, %v761_v2 }
 0x4d7   :  { %v752_v6 = vpop.xlane.xlu0 %751 }
 0x4d8   :  { %2728 = vpow2.f32 %v814_v3  ;;  %v816_v9 = vmul.f32 1.442695, %v793_v5  ;;  %v790_v10 = vsub.f32 %v3352_v7, %v752_v6 }
 0x4da   :  { %2730 = vpow2.f32 %v816_v9  ;;  %v810_v11 = vmul.f32 1.442695, %v790_v10 }
 0x4db   :  { %v755_v13 = vpop.xlane.xlu0 %754 }
 0x4dc   :  { %2732 = vpow2.f32 %v810_v11  ;;  %v791_v14 = vsub.f32 %v3360_v12, %v755_v13 }
 0x4dd   :  { %v773_v15 = vpop.xlane.xlu1 %772 }
 0x4de   :  { %v812_v16 = vmul.f32 1.442695, %v791_v14  ;;  %v797_v19 = vsub.f32 %v3366_v18, %v773_v15 }
 0x4df   :  { %v770_v4 = vpop.xlane.xlu0 %769 }
 0x4e0   :  { %2734 = vpow2.f32 %v812_v16  ;;  %v824_v20 = vmul.f32 1.442695, %v797_v19  ;;  %v796_v8 = vsub.f32 %v3364_v17, %v770_v4 }
 0x4e1   :  { %v767_v23 = vpop.xlane.xlu1 %766 }
 0x4e2   :  { %v3424_v25 = vpop.eup %2728  ;;  %2736 = vpow2.f32 %v824_v20  ;;  %v822_v7 = vmul.f32 1.442695, %v796_v8  ;;  %v795_v26 = vsub.f32 %v3370_v22, %v767_v23 }
 0x4e3   :  { %v764_v27 = vpop.xlane.xlu0 %763  ;;  %v852_v12 = vsel %vm737_vm3, %v3424_v25, 0.0 }
 0x4e4   :  { %v3429_v28 = vpop.eup %2730  ;;  %2738 = vpow2.f32 %v822_v7  ;;  %v820_v18 = vmul.f32 1.442695, %v795_v26  ;;  %v794_v56 = vsub.f32 %v3374_v24, %v764_v27  ;;  %853 = vadd.xlane.f32.xlu0 %v852_v12 }
 0x4e5   :  { %v855_v17 = vsel %vm737_vm3, %v3429_v28, 0.0  ;;  %v785_v48 = vpop.xlane.xlu1 %784 }
 0x4e6   :  { %v3434_v30 = vpop.eup %2732  ;;  %2740 = vpow2.f32 %v820_v18  ;;  %v818_v31 = vmul.f32 1.442695, %v794_v56  ;;  %856 = vadd.xlane.f32.xlu1 %v855_v17 }
 0x4e7   :  { %v776_v22 = vpop.xlane.xlu0 %775  ;;  %v846_v58 = vsel %vm737_vm3, %v3434_v30, 0.0 }
 0x4e8   :  { %2742 = vpow2.f32 %v818_v31  ;;  %847 = vadd.xlane.f32.xlu0 %v846_v58  ;;  %v798_v35 = vsub.f32 %v3380_v29, %v776_v22 }
 0x4e9   :  { %v779_v60 = vpop.xlane.xlu1 %778 }
 0x4ea   :  { %v3438_v34 = vpop.eup %2734  ;;  %v826_v41 = vmul.f32 1.442695, %v798_v35 }
 0x4eb   :  { %v782_v24 = vpop.xlane.xlu0 %781  ;;  %v849_v37 = vsel %vm737_vm3, %v3438_v34, 0.0 }
 0x4ec   :  { %v3443_v38 = vpop.eup %2736  ;;  %v800_v39 = vsub.f32 %v3390_v33, %v782_v24  ;;  %850 = vadd.xlane.f32.xlu1 %v849_v37 }
 0x4ed   :  { %v867_v44 = vsel %vm737_vm3, %v3443_v38, 0.0 }
 0x4ee   :  { %v3446_v40 = vpop.eup %2738  ;;  %v830_v43 = vmul.f32 1.442695, %v800_v39 }
 0x4ef   :  { %v864_v45 = vsel %vm737_vm3, %v3446_v40, 0.0 }
 0x4f0   :  { %v3452_v29 = vpop.eup %2740  ;;  %2744 = vpow2.f32 %v830_v43  ;;  %868 = vadd.xlane.f32.xlu1 %v867_v44  ;;  %865 = vadd.xlane.f32.xlu0 %v864_v45 }
 0x4f1   :  { %2746 = vpow2.f32 %v826_v41  ;;  %v861_v33 = vsel %vm737_vm3, %v3452_v29, 0.0 }
 0x4f2   :  { %v3454_v46 = vpop.eup %2742 }
 0x4f3   :  { %v858_v47 = vsel %vm737_vm3, %v3454_v46, 0.0 }
 0x4f4   :  { %862 = vadd.xlane.f32.xlu1 %v861_v33  ;;  %859 = vadd.xlane.f32.xlu0 %v858_v47 }
 0x4fa   :  { %v3460_v50 = vpop.eup %2744 }
 0x4fb   :  { %v876_v52 = vsel %vm737_vm3, %v3460_v50, 0.0  ;;  %v3464_v51 = vpop.eup %2746 }
 0x4fc   :  { %877 = vadd.xlane.f32.xlu0 %v876_v52  ;;  %v870_v63 = vsel %vm737_vm3, %v3464_v51, 0.0 }
 0x4fe   :  { %v842_v61 = vpop.xlane.xlu0 %841 }
 0x4ff   :  { %2748 = vrcp.f32 %v842_v61 }
 0x500   :  { %v845_v0 = vpop.xlane.xlu1 %844  ;;  %871 = vadd.xlane.f32.xlu0 %v870_v63 }
 0x501   :  { %2750 = vrcp.f32 %v845_v0 }
 0x502   :  { %v836_v1 = vpop.xlane.xlu0 %835 }
 0x503   :  { %2752 = vrcp.f32 %v836_v1 }
 0x504   :  { %v839_v2 = vpop.xlane.xlu1 %838 }
 0x505   :  { %2754 = vrcp.f32 %v839_v2  ;;  %980 = vrot.lane.b32.xlu1 %v3298_v36, %s3043_s5 }
 0x509   :  { %v2749_v3 = vpop.eup %2748  ;;  %1038 = vrot.lane.b32.xlu1 %v3290_v59, %s3043_s5  ;;  %v801_v59 = vsub.f32 %v3382_v57, %v785_v48 }
 0x50a   :  { %v3473_v6 = vmul.f32 %v2749_v3, %v3402_v53 }
 0x50b   :  { %v2751_v5 = vpop.eup %2750  ;;  %v832_v53 = vmul.f32 1.442695, %v801_v59  ;;  %v2608_v59 = vld [vmem:[%s3673_s6] sm:$0xff]  }
 0x50c   :  { %v3476_v9 = vmul.f32 %v2751_v5, %v3406_v54  ;;  %v799_v54 = vsub.f32 %v3386_v32, %v779_v60 }
 0x50d   :  { %v2753_v10 = vpop.eup %2752  ;;  %2756 = vpow2.f32 %v832_v53  ;;  %v2609_v53 = vld [vmem:[%s3673_s6 + $0x8] sm:$0xff]  }
 0x50e   :  { %v915_v11 = vpack.c.bf16 %v3476_v9, %v3473_v6  ;;  %v898_v14 = vmul.f32 %v2753_v10, %v3410_v55  ;;  %v828_v16 = vmul.f32 1.442695, %v799_v54 }
 0x50f   :  { %v2755_v13 = vpop.eup %2754 }
 0x510   :  { %v899_v36 = vmul.f32 %v2755_v13, %v3414_v62  ;;  %2758 = vpow2.f32 %v828_v16 }
 0x512   :  { %v914_v15 = vpack.c.bf16 %v899_v36, %v898_v14 }
 0x514   :  { %2467 = vmatprep.mubr.msk.bf16.mxu1 %vm737_vm3, %v914_v15 }
 0x516   :  { %922 = vrot.lane.b32.xlu0 %v3268_v49, %s3043_s5 }
 0x517   :  { %v3487_v19 = vpop.eup %2756 }
 0x518   :  { %v879_v55 = vsel %vm737_vm3, %v3487_v19, 0.0 }
 0x51a   :  { %v3491_v62 = vpop.eup %2758 }
 0x51b   :  { %v873_v4 = vsel %vm737_vm3, %v3491_v62, 0.0 }
 0x52d   :  { %880 = vadd.xlane.f32.xlu1 %v879_v55 }
 0x531   :  { %874 = vadd.xlane.f32.xlu1 %v873_v4 }
 0x542   :  { %1096 = vrot.lane.b32.xlu1 %v3312_v42, %s3043_s5 }
 0x571   :  { %v854_v49 = vpop.xlane.xlu0 %853 }
 0x573   :  { %v857_v57 = vpop.xlane.xlu1 %856 }
 0x574   :  { %2760 = vrcp.f32 %v857_v57 }
 0x575   :  { %v848_v32 = vpop.xlane.xlu0 %847 }
 0x576   :  { %2762 = vrcp.f32 %v848_v32 }
 0x577   :  { %2764 = vrcp.f32 %v854_v49  ;;  %v2611_v49 = vld [vmem:[%s3673_s6 + $0x18] sm:$0xff]  }
 0x579   :  { %v851_v20 = vpop.xlane.xlu1 %850 }
 0x57a   :  { %2766 = vrcp.f32 %v851_v20  ;;  %v2612_v20 = vld [vmem:[%s3673_s6 + $0x20] sm:$0xff]  }
 0x57d   :  { %v869_v8 = vpop.xlane.xlu1 %868  ;;  %v866_v23 = vpop.xlane.xlu0 %865 }
 0x57e   :  { %v2761_v7 = vpop.eup %2760 }
 0x57f   :  { %v905_v17 = vmul.f32 %v2761_v7, %v3429_v28  ;;  %v2615_v7 = vld [vmem:[%s3673_s6 + $0x38] sm:$0xff]  }
 0x580   :  { %v2763_v12 = vpop.eup %2762 }
 0x581   :  { %v863_v26 = vpop.xlane.xlu1 %862  ;;  %v860_v27 = vpop.xlane.xlu0 %859  ;;  %v902_v31 = vmul.f32 %v2763_v12, %v3434_v30 }
 0x582   :  { %v2765_v18 = vpop.eup %2764  ;;  %2768 = vrcp.f32 %v863_v26 }
 0x583   :  { %2770 = vrcp.f32 %v860_v27  ;;  %v904_v58 = vmul.f32 %v2765_v18, %v3424_v25 }
 0x584   :  { %v2767_v56 = vpop.eup %2766  ;;  %2772 = vrcp.f32 %v869_v8  ;;  %v2613_v8 = vld [vmem:[%s3673_s6 + $0x28] sm:$0xff]  }
 0x585   :  { %v981_v42 = vpop.permute.xlu1 %980  ;;  %v903_v22 = vmul.f32 %v2767_v56, %v3438_v34  ;;  %v917_v24 = vpack.c.bf16 %v905_v17, %v904_v58  ;;  %2774 = vrcp.f32 %v866_v23  ;;  %v2614_v23 = vld [vmem:[%s3673_s6 + $0x30] sm:$0xff]  }
 0x586   :  { %2471 = vmatprep.subr.bf16.mxu0 %v981_v42 }
 0x587   :  { %2472 = vmatpush3.bf16.msra.mxu0 %v981_v42  ;;  %v916_v35 = vpack.c.bf16 %v903_v22, %v902_v31 }
 0x589   :  { %2473 = vmatprep.mubr.msk.bf16.mxu0 %vm737_vm3, %v916_v35  ;;  %v878_v37 = vpop.xlane.xlu0 %877  ;;  %v1039_v25 = vpop.permute.xlu1 %1038 }
 0x58a   :  { %2474 = vmatmul.mubr.msk.bf16.vlgmr.msra.gmra.mrb[8].mxu0 %vm737_vm3, %v917_v24 }
 0x58c   :  { %v2769_v28 = vpop.eup %2768 }
 0x58d   :  { %v872_v39 = vpop.xlane.xlu0 %871  ;;  %v2771_v41 = vpop.eup %2770  ;;  %v907_v34 = vmul.f32 %v2769_v28, %v3452_v29 }
 0x58e   :  { %v906_v30 = vmul.f32 %v2771_v41, %v3454_v46  ;;  %v2773_v44 = vpop.eup %2772 }
 0x58f   :  { %v2775_v45 = vpop.eup %2774  ;;  %v909_v47 = vmul.f32 %v2773_v44, %v3443_v38 }
 0x590   :  { %v918_v33 = vpack.c.bf16 %v907_v34, %v906_v30  ;;  %v908_v46 = vmul.f32 %v2775_v45, %v3446_v40 }
 0x591   :  { %v923_v43 = vpop.permute.xlu0 %922 }
 0x592   :  { %2465 = vmatprep.subr.bf16.mxu1 %v923_v43  ;;  %v919_v29 = vpack.c.bf16 %v909_v47, %v908_v46 }
 0x593   :  { %2466 = vmatpush3.bf16.msra.mxu1 %v923_v43 }
 0x594   :  { %2477 = vmatprep.subr.bf16.mxu1 %v1039_v25 }
 0x596   :  { %2468 = vmatmul.mubr.msk.bf16.vlgmr.msra.gmra.mrb[16].mxu1 %vm737_vm3, %v915_v11 }
 0x597   :  { %2478 = vmatpush3.bf16.msra.mxu1 %v1039_v25  ;;  %2479 = vmatprep.mubr.msk.bf16.mxu1 %vm737_vm3, %v918_v33 }
 0x598   :  { %2489 = vmatprep.subr.bf16.mxu1 %v2608_v59 }
 0x59e   :  { %2480 = vmatmul.mubr.msk.bf16.vlgmr.msra.gmra.mrb[20].mxu1 %vm737_vm3, %v919_v29 }
 0x59f   :  { %2490 = vmatpush3.bf16.msra.mxu1 %v2608_v59  ;;  %v2628_v59 = vld [vmem:[#allocation11 + $0x60] ss:$24 sps:$4 sm:$0xff]  }
 0x5a0   :  { %2491 = vmatprep.subr.bf16.mxu1 %v2609_v53 }
 0x5a3   :  { %2492 = vmatpush3.bf16.msra.mxu1 %v2609_v53  ;;  %v2631_v53 = vld [vmem:[#allocation11 + $0x68] ss:$24 sps:$4 sm:$0xff]  }
 0x5ba   :  { %v881_v48 = vpop.xlane.xlu1 %880 }
 0x5bb   :  { %2776 = vrcp.f32 %v881_v48 }
 0x5bc   :  { %2778 = vrcp.f32 %v872_v39 }
 0x5bd   :  { %2780 = vrcp.f32 %v878_v37 }
 0x5be   :  { %v875_v52 = vpop.xlane.xlu1 %874 }
 0x5bf   :  { %2782 = vrcp.f32 %v875_v52 }
 0x5c2   :  { %v1097_v60 = vpop.permute.xlu1 %1096 }
 0x5c3   :  { %2483 = vmatprep.subr.bf16.mxu0 %v1097_v60 }
 0x5c4   :  { %2484 = vmatpush3.bf16.msra.mxu0 %v1097_v60 }
 0x5c5   :  { %v2777_v61 = vpop.eup %2776 }
 0x5c6   :  { %v2779_v63 = vpop.eup %2778  ;;  %v913_v38 = vmul.f32 %v2777_v61, %v3487_v19  ;;  %v2610_v19 = vld [vmem:[%s3673_s6 + $0x10] sm:$0xff]  }
 0x5c7   :  { %v2781_v0 = vpop.eup %2780  ;;  %v910_v40 = vmul.f32 %v2779_v63, %v3464_v51  ;;  %2493 = vmatprep.subr.bf16.mxu1 %v2610_v19 }
 0x5c8   :  { %v912_v3 = vmul.f32 %v2781_v0, %v3460_v50  ;;  %2494 = vmatpush3.bf16.msra.mxu1 %v2610_v19  ;;  %v2840_v19 = vld [vmem:[#allocation2] sm:$0xff] }
 0x5c9   :  { %v2783_v1 = vpop.eup %2782  ;;  %2495 = vmatprep.subr.bf16.mxu1 %v2611_v49 }
 0x5ca   :  { %v911_v2 = vmul.f32 %v2783_v1, %v3491_v62  ;;  %v921_v6 = vpack.c.bf16 %v913_v38, %v912_v3 }
 0x5cc   :  { %v920_v5 = vpack.c.bf16 %v911_v2, %v910_v40  ;;  %2496 = vmatpush3.bf16.msra.mxu1 %v2611_v49  ;;  %v2841_v49 = vld [vmem:[#allocation2 + $0x10] sm:$0xff] }
 0x5cd   :  { %2497 = vmatprep.subr.bf16.mxu1 %v2612_v20 }
 0x5ce   :  { %2485 = vmatprep.mubr.msk.bf16.mxu0 %vm737_vm3, %v920_v5 }
 0x5cf   :  { %2486 = vmatmul.mubr.msk.bf16.vlgmr.msra.gmra.mrb[12].mxu0 %vm737_vm3, %v921_v6  ;;  %v2616_v6 = vld [vmem:[#allocation11] ss:$24 sps:$4 sm:$0xff]  }
 0x5d0   :  { %1696 = vmatprep.mubr.bf16.mxu0 %v3045_v21  ;;  %2498 = vmatpush3.bf16.msra.mxu1 %v2612_v20 }
 0x5d1   :  { %2499 = vmatprep.subr.bf16.mxu1 %v2613_v8 }
 0x5d4   :  { %2500 = vmatpush3.bf16.msra.mxu1 %v2613_v8 }
 0x5d5   :  { %2501 = vmatprep.subr.bf16.mxu1 %v2614_v23 }
 0x5d8   :  { %2502 = vmatpush3.bf16.msra.mxu1 %v2614_v23 }
 0x5d9   :  { %2503 = vmatprep.subr.bf16.mxu1 %v2615_v7 }
 0x5dc   :  { %2504 = vmatpush3.bf16.msra.mxu1 %v2615_v7  ;;  %v2843_v7 = vld [vmem:[#allocation2 + $0x18] sm:$0xff] }
 0x65d   :  { %v2475_v9 = vpop.f32.mrb[8].mxu0 }
 0x65e   :  { %v1023_v10 = vpop.f32.mrb[9].mxu0 }
 0x65f   :  { %v2476_v11 = vpop.f32.mrb[10].mxu0 }
 0x660   :  { %v2559_v13 = vpack.i.bf16 %v2476_v11, %v2475_v9  ;;  %v1026_v14 = vpop.f32.mrb[11].mxu0  ;;  %v2618_v9 = vld [vmem:[#allocation11 + $0x4] ss:$24 sps:$4 sm:$0xff]  }
 0x661   :  { %v2564_v36 = vpack.i.bf16 %v1026_v14, %v1023_v10  ;;  %v2619_v10 = vld [vmem:[#allocation11 + $0x8] ss:$24 sps:$4 sm:$0xff]   ;;  %v2621_v11 = vld [vmem:[#allocation11 + $0xc] ss:$24 sps:$4 sm:$0xff]   ;;  %1664 = vmatprep.subr.bf16.mxu0 %v2618_v9  ;;  %v2627_v14 = vld [vmem:[#allocation11 + $0x3c] ss:$24 sps:$4 sm:$0xff]  }
 0x662   :  { %2560 = vrot.lane.b32.xlu1 %v2559_v13, %s3048_s12  ;;  %v2624_v13 = vld [vmem:[#allocation11 + $0x34] ss:$24 sps:$4 sm:$0xff]   ;;  %1665 = vmatpush1.bf16.msra.mxu0 %v2616_v6  ;;  %v2284_v9 = vld [vmem:[%s3677_s10] ss:$0 sm:$0xff]  ;;  %s3050_s10 = smov [#allocation14]  }
 0x663   :  { %1717 = vmatprep.subr.bf16.mxu1 %v2621_v11  ;;  %1666 = vmatprep.subr.bf16.mxu0 %v2624_v13 }
 0x666   :  { %2565 = vrot.lane.b32.xlu1 %v2564_v36, %s3043_s5  ;;  %v2622_v36 = vld [vmem:[#allocation11 + $0x30] ss:$24 sps:$4 sm:$0xff]  }
 0x667   :  { %1667 = vmatpush1.bf16.msra.mxu0 %v2622_v36  ;;  %v2664_v36 = vld [vmem:[#allocation11 + $0x10] ss:$24 sps:$4 sm:$0xff]  }
 0x669   :  { %v2469_v51 = vpop.f32.mrb[16].mxu1 }
 0x66a   :  { %v965_v50 = vpop.f32.mrb[17].mxu1 }
 0x66b   :  { %v2470_v15 = vpop.f32.mrb[18].mxu1 }
 0x66c   :  { %v2554_v54 = vpack.i.bf16 %v2470_v15, %v2469_v51  ;;  %v968_v16 = vpop.f32.mrb[19].mxu1  ;;  %v2625_v51 = vld [vmem:[#allocation11 + $0x38] ss:$24 sps:$4 sm:$0xff]   ;;  %v2633_v15 = vld [vmem:[#allocation11 + $0x6c] ss:$24 sps:$4 sm:$0xff]  }
 0x66e   :  { %2555 = vrot.lane.b32.xlu0 %v2554_v54, %s3049_s1 }
 0x671   :  { %v2481_v55 = vpop.f32.mrb[20].mxu1 }
 0x672   :  { %v1081_v62 = vpop.f32.mrb[21].mxu1 }
 0x673   :  { %v2482_v4 = vpop.f32.mrb[22].mxu1 }
 0x674   :  { %v2569_v57 = vpack.i.bf16 %v2482_v4, %v2481_v55  ;;  %v1084_v32 = vpop.f32.mrb[23].mxu1 }
 0x676   :  { %2570 = vrot.lane.b32.xlu0 %v2569_v57, %s3049_s1 }
 0x6a2   :  { %v2487_v26 = vpop.f32.mrb[12].mxu0 }
 0x6a3   :  { %v1139_v27 = vpop.f32.mrb[13].mxu0 }
 0x6a4   :  { %v2488_v12 = vpop.f32.mrb[14].mxu0 }
 0x6a5   :  { %v2579_v18 = vpack.i.bf16 %v2488_v12, %v2487_v26  ;;  %v1142_v56 = vpop.f32.mrb[15].mxu0 }
 0x6a6   :  { %v2574_v17 = vpack.i.bf16 %v1142_v56, %v1139_v27  ;;  %v2634_v56 = vld [vmem:[#allocation11 + $0x90] ss:$24 sps:$4 sm:$0xff]  }
 0x6a7   :  { %2580 = vrot.lane.b32.xlu1 %v2579_v18, %s3048_s12  ;;  %v2636_v18 = vld [vmem:[#allocation11 + $0x94] ss:$24 sps:$4 sm:$0xff]   ;;  %s2228_s12 = sshll.u32 %s3050_s10, 4  ;;  %s2229_s12 = int_to_ptr.vmem [resolvable:$true] %s2228_s12 }
 0x6a8   :  { %2575 = vrot.lane.b32.xlu0 %v2574_v17, %s3043_s5  ;;  %v2639_v17 = vld [vmem:[#allocation11 + $0x9c] ss:$24 sps:$4 sm:$0xff]   ;;  %s2998_s16 = scalar_lea.vmem %s2229_s12, 512  ;;  %p3003_p1 = scmp.lt.s32.totalorder %s2229_s12, %s2229_s12 }
 0x6a9   :  { %p2999_p0 = scmp.ne.s32.totalorder %s2229_s12, %s2998_s16  ;;  %p3004_p2 = scmp.lt.s32.totalorder %s2998_s16, %s2998_s16 }
 0x6ab   :  { %p3005_p3 = por %p3004_p2, %p3003_p1 }
 0x6ad   :  { %p3006_p4 = pnand %p3005_p3, %p2999_p0 }
 0x6d4   :  { %v2561_v42 = vpop.permute.xlu1 %2560 }
 0x6d5   :  { %v2563_v28 = vunpack.i.h.bf16 %v2561_v42  ;;  %v2562_v39 = vunpack.i.l.bf16 %v2561_v42  ;;  %v2637_v42 = vld [vmem:[#allocation11 + $0x98] ss:$24 sps:$4 sm:$0xff]  }
 0x6d8   :  { %v2566_v31 = vpop.permute.xlu1 %2565 }
 0x6d9   :  { %v2568_v24 = vunpack.i.h.bf16 %v2566_v31  ;;  %v2567_v37 = vunpack.i.l.bf16 %v2566_v31  ;;  %v2642_v31 = vld [vmem:[#allocation11 + $0xc4] ss:$24 sps:$4 sm:$0xff]  }
 0x6e0   :  { %v2556_v22 = vpop.permute.xlu0 %2555 }
 0x6e1   :  { %v2558_v58 = vunpack.i.h.bf16 %v2556_v22  ;;  %v2557_v35 = vunpack.i.l.bf16 %v2556_v22  ;;  %v2640_v22 = vld [vmem:[#allocation11 + $0xc0] ss:$24 sps:$4 sm:$0xff]  }
 0x6e3   :  { %v1178_v41 = vsel %vm504_vm2, %v965_v50, %v2557_v35  ;;  %v1179_v43 = vsel %vm504_vm2, %v968_v16, %v2558_v58  ;;  %v2630_v50 = vld [vmem:[#allocation11 + $0x64] ss:$24 sps:$4 sm:$0xff]   ;;  %v2643_v35 = vld [vmem:[#allocation11 + $0xc8] ss:$24 sps:$4 sm:$0xff]  }
 0x6e4   :  { %v1181_v30 = vsel %vm1180_vm4, %v1178_v41, %v2567_v37  ;;  %v1182_v34 = vsel %vm1180_vm4, %v1179_v43, %v2568_v24  ;;  %1668 = vmatprep.subr.bf16.mxu0 %v2630_v50  ;;  %v2645_v58 = vld [vmem:[#allocation11 + $0xcc] ss:$24 sps:$4 sm:$0xff]   ;;  %v2646_v37 = vld [vmem:[#allocation11 + $0xf0] ss:$24 sps:$4 sm:$0xff]   ;;  %v2652_v41 = vld [vmem:[#allocation11 + $0x120] ss:$24 sps:$4 sm:$0xff]  }
 0x6e5   :  { %v1184_v25 = vsel %vm1183_vm5, %v1181_v30, %v2562_v39  ;;  %v1185_v44 = vsel %vm1183_vm5, %v1182_v34, %v2563_v28  ;;  %1669 = vmatpush1.bf16.msra.mxu0 %v2628_v59  ;;  %v2648_v24 = vld [vmem:[#allocation11 + $0xf4] ss:$24 sps:$4 sm:$0xff]   ;;  %v2649_v39 = vld [vmem:[#allocation11 + $0xf8] ss:$24 sps:$4 sm:$0xff]   ;;  %v2654_v43 = vld [vmem:[#allocation11 + $0x124] ss:$24 sps:$4 sm:$0xff]  }
 0x6e6   :  { %v1216_v45 = vpack.c.bf16 %v1185_v44, %v1184_v25  ;;  %1670 = vmatprep.subr.bf16.mxu0 %v2636_v18  ;;  %v2651_v28 = vld [vmem:[#allocation11 + $0xfc] ss:$24 sps:$4 sm:$0xff]   ;;  %v2655_v30 = vld [vmem:[#allocation11 + $0x128] ss:$24 sps:$4 sm:$0xff]   ;;  %v2657_v34 = vld [vmem:[#allocation11 + $0x12c] ss:$24 sps:$4 sm:$0xff]  }
 0x6e7   :  { %v2660_v25 = vld [vmem:[#allocation11 + $0x154] ss:$24 sps:$4 sm:$0xff]   ;;  %v2669_v50 = vld [vmem:[#allocation11 + $0x44] ss:$24 sps:$4 sm:$0xff]  }
 0x6e8   :  { %2505 = vmatprep.mubr.bf16.mxu1 %v1216_v45  ;;  %v2571_v33 = vpop.permute.xlu0 %2570  ;;  %v2663_v44 = vld [vmem:[#allocation11 + $0x15c] ss:$24 sps:$4 sm:$0xff]   ;;  %v2658_v45 = vld [vmem:[#allocation11 + $0x150] ss:$24 sps:$4 sm:$0xff]  }
 0x6e9   :  { %v2573_v47 = vunpack.i.h.bf16 %v2571_v33  ;;  %v2572_v46 = vunpack.i.l.bf16 %v2571_v33  ;;  %1671 = vmatpush1.bf16.msra.mxu0 %v2634_v56  ;;  %v2661_v33 = vld [vmem:[#allocation11 + $0x158] ss:$24 sps:$4 sm:$0xff]   ;;  %v2684_v18 = vld [vmem:[#allocation11 + $0x134] ss:$24 sps:$4 sm:$0xff]  }
 0x6ea   :  { %1672 = vmatprep.subr.bf16.mxu0 %v2642_v31  ;;  %v2682_v56 = vld [vmem:[#allocation11 + $0x130] ss:$24 sps:$4 sm:$0xff]   ;;  %v2688_v31 = vld [vmem:[#allocation13 + $0x40] sm:$0xff]  }
 0x6eb   :  { %v1210_v61 = vsel %vm504_vm2, %v1081_v62, %v2572_v46  ;;  %v1211_v63 = vsel %vm504_vm2, %v1084_v32, %v2573_v47  ;;  %v2842_v32 = vld [vmem:[#allocation2 + $0x8] sm:$0xff] }
 0x6ec   :  { %v2666_v47 = vld [vmem:[#allocation11 + $0x14] ss:$24 sps:$4 sm:$0xff]  }
 0x6ed   :  { %1673 = vmatpush1.bf16.msra.mxu0 %v2640_v22  ;;  %v2689_v22 = vld [vmem:[#allocation13] sm:$0xff]  }
 0x6ee   :  { %1674 = vmatprep.subr.bf16.mxu0 %v2648_v24  ;;  %v2692_v24 = vld [vmem:[#allocation13 + $0x50] sm:$0xff]  }
 0x6f1   :  { %1675 = vmatpush1.bf16.msra.mxu0 %v2646_v37  ;;  %v2693_v37 = vld [vmem:[#allocation13 + $0x80] sm:$0xff]  }
 0x6f2   :  { %1676 = vmatprep.subr.bf16.mxu0 %v2654_v43  ;;  %v2697_v43 = vld [vmem:[#allocation13 + $0x18] sm:$0xff]  }
 0x6f5   :  { %1677 = vmatpush1.bf16.msra.mxu0 %v2652_v41  ;;  %v2696_v41 = vld [vmem:[#allocation13 + $0x88] sm:$0xff]  }
 0x6f6   :  { %1678 = vmatprep.subr.bf16.mxu0 %v2660_v25  ;;  %v2701_v25 = vld [vmem:[#allocation13 + $0x68] sm:$0xff]  }
 0x6f9   :  { %1679 = vmatpush1.bf16.msra.mxu0 %v2658_v45  ;;  %v2703_v45 = vld [vmem:[#allocation13 + $0x28] sm:$0xff]  }
 0x6fa   :  { %1770 = vmatprep.subr.bf16.mxu0 %v2666_v47  ;;  %v2705_v47 = vld [vmem:[#allocation13 + $0xa0] sm:$0xff]  }
 0x719   :  { %v2581_v29 = vpop.permute.xlu1 %2580 }
 0x71a   :  { %v2576_v48 = vpop.permute.xlu0 %2575  ;;  %v2583_v0 = vunpack.i.h.bf16 %v2581_v29  ;;  %v2582_v1 = vunpack.i.l.bf16 %v2581_v29 }
 0x71b   :  { %v2578_v52 = vunpack.i.h.bf16 %v2576_v48  ;;  %v2577_v60 = vunpack.i.l.bf16 %v2576_v48 }
 0x71d   :  { %v1212_v38 = vsel %vm1180_vm4, %v1210_v61, %v2577_v60  ;;  %v1213_v40 = vsel %vm1180_vm4, %v1211_v63, %v2578_v52 }
 0x71e   :  { %v1214_v2 = vsel %vm1183_vm5, %v1212_v38, %v2582_v1  ;;  %v1215_v3 = vsel %vm1183_vm5, %v1213_v40, %v2583_v0 }
 0x71f   :  { %v1217_v5 = vpack.c.bf16 %v1215_v3, %v1214_v2 }
 0x721   :  { %2506 = vmatmul.mubr.bf16.vlgmr.msra.gmra.mrb[24].mxu1 %v1217_v5 }
 0x722   :  { %1749 = vmatprep.mubr.bf16.mxu1 %v3045_v21  ;;  %1718 = vmatpush1.bf16.msra.mxu1 %v2619_v10 }
 0x723   :  { %1719 = vmatprep.subr.bf16.mxu1 %v2627_v14 }
 0x726   :  { %1720 = vmatpush1.bf16.msra.mxu1 %v2625_v51 }
 0x727   :  { %1721 = vmatprep.subr.bf16.mxu1 %v2633_v15 }
 0x72a   :  { %1722 = vmatpush1.bf16.msra.mxu1 %v2631_v53 }
 0x72b   :  { %1723 = vmatprep.subr.bf16.mxu1 %v2639_v17  ;;  %v2687_v17 = vld [vmem:[#allocation11 + $0x164] ss:$24 sps:$4 sm:$0xff]  }
 0x72e   :  { %1724 = vmatpush1.bf16.msra.mxu1 %v2637_v42  ;;  %v2685_v42 = vld [vmem:[#allocation11 + $0x160] ss:$24 sps:$4 sm:$0xff]  }
 0x72f   :  { %1725 = vmatprep.subr.bf16.mxu1 %v2645_v58  ;;  %v2690_v58 = vld [vmem:[#allocation13 + $0x48] sm:$0xff]  }
 0x732   :  { %1726 = vmatpush1.bf16.msra.mxu1 %v2643_v35  ;;  %v2691_v35 = vld [vmem:[#allocation13 + $0x8] sm:$0xff]  }
 0x733   :  { %1727 = vmatprep.subr.bf16.mxu1 %v2651_v28  ;;  %v2694_v28 = vld [vmem:[#allocation13 + $0x10] sm:$0xff]  }
 0x736   :  { %1728 = vmatpush1.bf16.msra.mxu1 %v2649_v39  ;;  %v2695_v39 = vld [vmem:[#allocation13 + $0x58] sm:$0xff]  }
 0x737   :  { %1729 = vmatprep.subr.bf16.mxu1 %v2657_v34  ;;  %v2700_v34 = vld [vmem:[#allocation13 + $0x20] sm:$0xff]  }
 0x73a   :  { %1730 = vmatpush1.bf16.msra.mxu1 %v2655_v30  ;;  %v2699_v30 = vld [vmem:[#allocation13 + $0x90] sm:$0xff]  }
 0x73b   :  { %1731 = vmatprep.subr.bf16.mxu1 %v2663_v44  ;;  %v2702_v44 = vld [vmem:[#allocation13 + $0x98] sm:$0xff]  }
 0x73e   :  { %1732 = vmatpush1.bf16.msra.mxu1 %v2661_v33  ;;  %v2704_v33 = vld [vmem:[#allocation13 + $0x70] sm:$0xff]  }
 0x73f   :  { %2403 = vmatprep.subr.bf16.mxu1 %v2688_v31 }
 0x7f4   :  { %v2507_v54 = vpop.f32.mrb[24].mxu1 }
 0x7f5   :  { %v1316_v16 = vpop.f32.mrb[25].mxu1  ;;  %v3563_v57 = vadd.f32 %v2841_v49, %v2507_v54  ;;  %v2667_v54 = vld [vmem:[#allocation11 + $0x40] ss:$24 sps:$4 sm:$0xff]  }
 0x7f6   :  { %v3561_v55 = vadd.f32 %v2840_v19, %v1316_v16  ;;  %v2508_v62 = vpop.f32.mrb[26].mxu1  ;;  %v2672_v16 = vld [vmem:[#allocation11 + $0x74] ss:$24 sps:$4 sm:$0xff]  }
 0x7f7   :  { %v1319_v4 = vpop.f32.mrb[27].mxu1  ;;  %v3571_v26 = vadd.f32 %v2843_v7, %v2508_v62  ;;  %v1338_v27 = vmul.f32 %v3563_v57, %v3563_v57  ;;  %v2676_v7 = vld [vmem:[#allocation11 + $0xd0] ss:$24 sps:$4 sm:$0xff]  }
 0x7f8   :  { %v3565_v20 = vadd.f32 %v2842_v32, %v1319_v4  ;;  %v1336_v8 = vmul.f32 %v3561_v55, %v3561_v55  ;;  %v2670_v4 = vld [vmem:[#allocation11 + $0x70] ss:$24 sps:$4 sm:$0xff]   ;;  %v2675_v32 = vld [vmem:[#allocation11 + $0xa4] ss:$24 sps:$4 sm:$0xff]  }
 0x7f9   :  { %v1339_v12 = vmul.f32 %v3571_v26, %v3571_v26 }
 0x7fa   :  { %1340 = vadd.xlane.f32.xlu0 %v1336_v8  ;;  %v1337_v23 = vmul.f32 %v3565_v20, %v3565_v20  ;;  %v2673_v8 = vld [vmem:[#allocation11 + $0xa0] ss:$24 sps:$4 sm:$0xff]  }
 0x7fc   :  { %1342 = vadd.xlane.f32.xlu1 %v1337_v23  ;;  %v2678_v23 = vld [vmem:[#allocation11 + $0xd4] ss:$24 sps:$4 sm:$0xff]  }
 0x7fe   :  { %1344 = vadd.xlane.f32.xlu0 %v1338_v27  ;;  %v2681_v27 = vld [vmem:[#allocation11 + $0x104] ss:$24 sps:$4 sm:$0xff]  }
 0x802   :  { %1346 = vadd.xlane.f32.xlu0 %v1339_v12  ;;  %v2679_v12 = vld [vmem:[#allocation11 + $0x100] ss:$24 sps:$4 sm:$0xff]  }
 0x887   :  { %v1341_v46 = vpop.xlane.xlu0 %1340 }
 0x888   :  { %v1348_v29 = vmul.f32 0.0078125, %v1341_v46  ;;  %v2706_v46 = vld [vmem:[#allocation13 + $0x30] sm:$0xff]  }
 0x889   :  { %v1343_v48 = vpop.xlane.xlu1 %1342 }
 0x88a   :  { %v1352_v52 = vadd.f32 1e-05, %v1348_v29  ;;  %v1349_v60 = vmul.f32 0.0078125, %v1343_v48  ;;  %v2707_v29 = vld [vmem:[#allocation13 + $0x78] sm:$0xff]   ;;  %v2708_v48 = vld [vmem:[#allocation13 + $0xa8] sm:$0xff]  }
 0x88b   :  { %v1345_v61 = vpop.xlane.xlu0 %1344 }
 0x88c   :  { %2784 = vrsqrt.f32 %v1352_v52  ;;  %v1353_v63 = vadd.f32 1e-05, %v1349_v60  ;;  %v1350_v0 = vmul.f32 0.0078125, %v1345_v61  ;;  %v2709_v52 = vld [vmem:[#allocation13 + $0x38] sm:$0xff]   ;;  %v2710_v60 = vld [vmem:[#allocation13 + $0xb0] sm:$0xff]  }
 0x88d   :  { %v2711_v61 = vld [vmem:[#allocation13 + $0xb8] sm:$0xff]  }
 0x88e   :  { %2786 = vrsqrt.f32 %v1353_v63  ;;  %v1354_v1 = vadd.f32 1e-05, %v1350_v0 }
 0x88f   :  { %v1347_v38 = vpop.xlane.xlu0 %1346 }
 0x890   :  { %v1351_v40 = vmul.f32 0.0078125, %v1347_v38  ;;  %2788 = vrsqrt.f32 %v1354_v1 }
 0x892   :  { %v1355_v2 = vadd.f32 1e-05, %v1351_v40 }
 0x894   :  { %2790 = vrsqrt.f32 %v1355_v2 }
 0x896   :  { %v2785_v3 = vpop.eup %2784 }
 0x897   :  { %v1360_v5 = vmul.f32 %v2785_v3, %v3561_v55 }
 0x898   :  { %v2787_v6 = vpop.eup %2786 }
 0x899   :  { %v1361_v10 = vmul.f32 %v2787_v6, %v3565_v20  ;;  %v1370_v11 = vmul.f32 %v2284_v9, %v1360_v5 }
 0x89a   :  { %v2789_v14 = vpop.eup %2788 }
 0x89b   :  { %v1371_v13 = vmul.f32 %v2284_v9, %v1361_v10  ;;  %v1362_v59 = vmul.f32 %v2789_v14, %v3563_v57 }
 0x89d   :  { %v1374_v51 = vpack.c.bf16 %v1371_v13, %v1370_v11  ;;  %v1372_v62 = vmul.f32 %v2284_v9, %v1362_v59 }
 0x89e   :  { %v2791_v15 = vpop.eup %2790 }
 0x89f   :  { %1697 = vmatmul.mubr.bf16.vlgmr.msra.gmra.mrb[16].mxu0 %v1374_v51  ;;  %1750 = vmatmul.mubr.bf16.vlgmr.msra.gmra.mrb[28].mxu1 %v1374_v51  ;;  %v1363_v53 = vmul.f32 %v2791_v15, %v3571_v26 }
 0x8a0   :  { %1771 = vmatpush1.bf16.msra.mxu0 %v2664_v36  ;;  %1706 = vmatprep.mubr.bf16.mxu0 %v3045_v21 }
 0x8a1   :  { %1772 = vmatprep.subr.bf16.mxu0 %v2669_v50  ;;  %1759 = vmatprep.mubr.bf16.mxu1 %v3045_v21  ;;  %v1373_v19 = vmul.f32 %v2284_v9, %v1363_v53 }
 0x8a2   :  { %2404 = vmatpush3.bf16.msra.mxu1 %v2689_v22 }
 0x8a3   :  { %v1375_v49 = vpack.c.bf16 %v1373_v19, %v1372_v62  ;;  %2405 = vmatprep.subr.bf16.mxu1 %v2690_v58 }
 0x8a4   :  { %1773 = vmatpush1.bf16.msra.mxu0 %v2667_v54 }
 0x8a5   :  { %1774 = vmatprep.subr.bf16.mxu0 %v2672_v16 }
 0x8a6   :  { %2406 = vmatpush3.bf16.msra.mxu1 %v2691_v35 }
 0x8a7   :  { %1707 = vmatmul.mubr.bf16.gmra.mrb[20].mxu0 %v1375_v49  ;;  %1760 = vmatmul.mubr.bf16.gmra.mrb[32].mxu1 %v1375_v49 }
 0x8a8   :  { %1775 = vmatpush1.bf16.msra.mxu0 %v2670_v4  ;;  %1802 = vmatprep.mubr.bf16.mxu0 %v3045_v21 }
 0x8a9   :  { %1776 = vmatprep.subr.bf16.mxu0 %v2675_v32  ;;  %2407 = vmatprep.subr.bf16.mxu1 %v2692_v24 }
 0x8aa   :  { %2408 = vmatpush3.bf16.msra.mxu1 %v2694_v28 }
 0x8ab   :  { %2409 = vmatprep.subr.bf16.mxu1 %v2695_v39 }
 0x8ac   :  { %1777 = vmatpush1.bf16.msra.mxu0 %v2673_v8 }
 0x8ad   :  { %1778 = vmatprep.subr.bf16.mxu0 %v2678_v23 }
 0x8ae   :  { %2410 = vmatpush3.bf16.msra.mxu1 %v2697_v43 }
 0x8b0   :  { %1779 = vmatpush1.bf16.msra.mxu0 %v2676_v7 }
 0x8b1   :  { %1780 = vmatprep.subr.bf16.mxu0 %v2681_v27 }
 0x8b4   :  { %1781 = vmatpush1.bf16.msra.mxu0 %v2679_v12 }
 0x8b5   :  { %1782 = vmatprep.subr.bf16.mxu0 %v2684_v18 }
 0x8b8   :  { %1783 = vmatpush1.bf16.msra.mxu0 %v2682_v56 }
 0x8b9   :  { %1784 = vmatprep.subr.bf16.mxu0 %v2687_v17 }
 0x8bc   :  { %1785 = vmatpush1.bf16.msra.mxu0 %v2685_v42 }
 0x8bd   :  { %2509 = vmatprep.subr.bf16.mxu0 %v2693_v37 }
 0x8bf   :  { %1803 = vmatmul.mubr.bf16.vlgmr.msra.gmra.mrb[24].mxu0 %v1374_v51 }
 0x8c0   :  { %1812 = vmatprep.mubr.bf16.mxu0 %v3045_v21  ;;  %2510 = vmatpush3.bf16.msra.mxu0 %v2693_v37  ;;  %v2698_v21 = vld [vmem:[#allocation13 + $0x60] sm:$0xff]  }
 0x8c1   :  { %2511 = vmatprep.subr.bf16.mxu0 %v2696_v41  ;;  %2411 = vmatprep.subr.bf16.mxu1 %v2698_v21 }
 0x8c2   :  { %2412 = vmatpush3.bf16.msra.mxu1 %v2700_v34 }
 0x8c3   :  { %2413 = vmatprep.subr.bf16.mxu1 %v2701_v25 }
 0x8c4   :  { %2512 = vmatpush3.bf16.msra.mxu0 %v2696_v41 }
 0x8c5   :  { %2513 = vmatprep.subr.bf16.mxu0 %v2699_v30 }
 0x8c6   :  { %2414 = vmatpush3.bf16.msra.mxu1 %v2703_v45 }
 0x8c7   :  { %1813 = vmatmul.mubr.bf16.gmra.mrb[28].mxu0 %v1375_v49  ;;  %2415 = vmatprep.subr.bf16.mxu1 %v2704_v33 }
 0x8c8   :  { %2514 = vmatpush3.bf16.msra.mxu0 %v2699_v30 }
 0x8c9   :  { %2515 = vmatprep.subr.bf16.mxu0 %v2702_v44 }
 0x8ca   :  { %2416 = vmatpush3.bf16.msra.mxu1 %v2706_v46 }
 0x8cb   :  { %2417 = vmatprep.subr.bf16.mxu1 %v2707_v29 }
 0x8cc   :  { %2516 = vmatpush3.bf16.msra.mxu0 %v2702_v44 }
 0x8cd   :  { %2517 = vmatprep.subr.bf16.mxu0 %v2705_v47 }
 0x8ce   :  { %2418 = vmatpush3.bf16.msra.mxu1 %v2709_v52 }
 0x8d0   :  { %2518 = vmatpush3.bf16.msra.mxu0 %v2705_v47 }
 0x8d1   :  { %2519 = vmatprep.subr.bf16.mxu0 %v2708_v48 }
 0x8d4   :  { %2520 = vmatpush3.bf16.msra.mxu0 %v2708_v48 }
 0x8d5   :  { %2521 = vmatprep.subr.bf16.mxu0 %v2710_v60 }
 0x8d8   :  { %2522 = vmatpush3.bf16.msra.mxu0 %v2710_v60 }
 0x8d9   :  { %2523 = vmatprep.subr.bf16.mxu0 %v2711_v61 }
 0x8dc   :  { %2524 = vmatpush3.bf16.msra.mxu0 %v2711_v61 }
 0x972   :  { %v3588_v63 = vpop.f32.mrb[16].mxu0  ;;  %v3590_v0 = vpop.f32.mrb[28].mxu1 }
 0x973   :  { %v2333_v1 = vmul.f32 -1.442695, %v3588_v63  ;;  %v2335_v38 = vmul.f32 -1.442695, %v3590_v0  ;;  %v3594_v40 = vpop.f32.mrb[17].mxu0  ;;  %v3596_v2 = vpop.f32.mrb[29].mxu1 }
 0x974   :  { %v2334_v3 = vmul.f32 -1.442695, %v3594_v40  ;;  %v3599_v5 = vpop.f32.mrb[18].mxu0  ;;  %v3601_v6 = vpop.f32.mrb[30].mxu1 }
 0x975   :  { %2792 = vpow2.f32 %v2333_v1  ;;  %v2336_v9 = vmul.f32 -1.442695, %v3599_v5  ;;  %v2338_v10 = vmul.f32 -1.442695, %v3601_v6  ;;  %v3605_v11 = vpop.f32.mrb[19].mxu0  ;;  %v3607_v13 = vpop.f32.mrb[31].mxu1 }
 0x976   :  { %2794 = vpow2.f32 %v2335_v38  ;;  %v2337_v14 = vmul.f32 -1.442695, %v3605_v11 }
 0x977   :  { %2796 = vpow2.f32 %v2334_v3 }
 0x978   :  { %2798 = vpow2.f32 %v2336_v9 }
 0x979   :  { %2800 = vpow2.f32 %v2338_v10 }
 0x97a   :  { %2802 = vpow2.f32 %v2337_v14  ;;  %v3610_v36 = vpop.f32.mrb[20].mxu0  ;;  %v3612_v51 = vpop.f32.mrb[32].mxu1 }
 0x97b   :  { %v2339_v50 = vmul.f32 -1.442695, %v3610_v36  ;;  %v2341_v15 = vmul.f32 -1.442695, %v3612_v51  ;;  %v3616_v59 = vpop.f32.mrb[21].mxu0  ;;  %v3618_v53 = vpop.f32.mrb[33].mxu1 }
 0x97c   :  { %v2340_v54 = vmul.f32 -1.442695, %v3616_v59  ;;  %v3621_v16 = vpop.f32.mrb[22].mxu0  ;;  %v3623_v19 = vpop.f32.mrb[34].mxu1 }
 0x97d   :  { %2804 = vpow2.f32 %v2339_v50  ;;  %v2342_v62 = vmul.f32 -1.442695, %v3621_v16  ;;  %v2344_v4 = vmul.f32 -1.442695, %v3623_v19  ;;  %v3627_v49 = vpop.f32.mrb[23].mxu0  ;;  %v3629_v32 = vpop.f32.mrb[35].mxu1 }
 0x97e   :  { %2806 = vpow2.f32 %v2341_v15  ;;  %v2343_v58 = vmul.f32 -1.442695, %v3627_v49 }
 0x97f   :  { %v2793_v8 = vpop.eup %2792  ;;  %2808 = vpow2.f32 %v2340_v54 }
 0x980   :  { %v2795_v23 = vpop.eup %2794  ;;  %v1859_v7 = vadd.f32 1.0, %v2793_v8  ;;  %2810 = vpow2.f32 %v2342_v62 }
 0x981   :  { %v2797_v27 = vpop.eup %2796  ;;  %v1861_v12 = vadd.f32 1.0, %v2795_v23  ;;  %2812 = vpow2.f32 %v2344_v4 }
 0x982   :  { %v2799_v18 = vpop.eup %2798  ;;  %2814 = vrcp.f32 %v1859_v7  ;;  %v1860_v56 = vadd.f32 1.0, %v2797_v27 }
 0x983   :  { %v2801_v17 = vpop.eup %2800  ;;  %2816 = vrcp.f32 %v1861_v12  ;;  %v1862_v42 = vadd.f32 1.0, %v2799_v18 }
 0x984   :  { %v2803_v31 = vpop.eup %2802  ;;  %2818 = vrcp.f32 %v1860_v56  ;;  %v1864_v22 = vadd.f32 1.0, %v2801_v17 }
 0x985   :  { %2820 = vrcp.f32 %v1862_v42  ;;  %v1863_v35 = vadd.f32 1.0, %v2803_v31 }
 0x986   :  { %2822 = vrcp.f32 %v1864_v22 }
 0x987   :  { %v2805_v24 = vpop.eup %2804  ;;  %2824 = vrcp.f32 %v1863_v35 }
 0x988   :  { %v2807_v37 = vpop.eup %2806  ;;  %v1865_v28 = vadd.f32 1.0, %v2805_v24  ;;  %2826 = vpow2.f32 %v2343_v58 }
 0x989   :  { %v2809_v39 = vpop.eup %2808  ;;  %v1867_v41 = vadd.f32 1.0, %v2807_v37 }
 0x98a   :  { %v2811_v43 = vpop.eup %2810  ;;  %2828 = vrcp.f32 %v1865_v28  ;;  %v1866_v21 = vadd.f32 1.0, %v2809_v39 }
 0x98b   :  { %v2813_v30 = vpop.eup %2812  ;;  %2830 = vrcp.f32 %v1867_v41  ;;  %v1868_v34 = vadd.f32 1.0, %v2811_v43 }
 0x98c   :  { %v2815_v25 = vpop.eup %2814  ;;  %2832 = vrcp.f32 %v1866_v21  ;;  %v1870_v44 = vadd.f32 1.0, %v2813_v30 }
 0x98d   :  { %v2817_v45 = vpop.eup %2816  ;;  %v1895_v33 = vmul.f32 %v2815_v25, %v3588_v63  ;;  %2834 = vrcp.f32 %v1868_v34 }
 0x98e   :  { %v2819_v47 = vpop.eup %2818  ;;  %2836 = vrcp.f32 %v1870_v44  ;;  %v1897_v38 = vmul.f32 %v2817_v45, %v3590_v0 }
 0x98f   :  { %v2821_v46 = vpop.eup %2820  ;;  %v1907_v29 = vmul.f32 %v1895_v33, %v3596_v2  ;;  %v1896_v61 = vmul.f32 %v2819_v47, %v3594_v40 }
 0x990   :  { %v2823_v48 = vpop.eup %2822  ;;  %v1898_v52 = vmul.f32 %v2821_v46, %v3599_v5 }
 0x991   :  { %v2825_v60 = vpop.eup %2824  ;;  %v1900_v2 = vmul.f32 %v2823_v48, %v3601_v6 }
 0x992   :  { %v2827_v1 = vpop.eup %2826  ;;  %v1910_v3 = vmul.f32 %v1898_v52, %v3607_v13  ;;  %v1804_v9 = vpop.f32.mrb[24].mxu0  ;;  %v1899_v63 = vmul.f32 %v2825_v60, %v3605_v11 }
 0x993   :  { %v1869_v10 = vadd.f32 1.0, %v2827_v1  ;;  %v1908_v14 = vmul.f32 %v1896_v61, %v1804_v9  ;;  %v1806_v50 = vpop.f32.mrb[25].mxu0 }
 0x994   :  { %v2829_v15 = vpop.eup %2828  ;;  %v1919_v54 = vpack.c.bf16 %v1910_v3, %v1907_v29  ;;  %v1909_v62 = vmul.f32 %v1897_v38, %v1806_v50  ;;  %v1808_v5 = vpop.f32.mrb[26].mxu0 }
 0x995   :  { %v2831_v4 = vpop.eup %2830  ;;  %v1901_v40 = vmul.f32 %v2829_v15, %v3610_v36  ;;  %2838 = vrcp.f32 %v1869_v10  ;;  %v1911_v8 = vmul.f32 %v1899_v63, %v1808_v5  ;;  %v1810_v0 = vpop.f32.mrb[27].mxu0 }
 0x996   :  { %v2833_v23 = vpop.eup %2832  ;;  %v1912_v13 = vmul.f32 %v1900_v2, %v1810_v0  ;;  %v1903_v17 = vmul.f32 %v2831_v4, %v3612_v51 }
 0x997   :  { %v2835_v7 = vpop.eup %2834  ;;  %v1913_v11 = vmul.f32 %v1901_v40, %v3618_v53  ;;  %v1920_v27 = vpack.c.bf16 %v1911_v8, %v1908_v14  ;;  %v1902_v6 = vmul.f32 %v2833_v23, %v3616_v59 }
 0x998   :  { %v1904_v12 = vmul.f32 %v2835_v7, %v3621_v16  ;;  %v1921_v18 = vpack.c.bf16 %v1912_v13, %v1909_v62  ;;  %v2837_v56 = vpop.eup %2836 }
 0x999   :  { %2149 = vmatprep.mubr.bf16.mxu1 %v1920_v27  ;;  %v1906_v58 = vmul.f32 %v2837_v56, %v3623_v19 }
 0x99a   :  { %v1916_v36 = vmul.f32 %v1904_v12, %v3629_v32  ;;  %v1814_v42 = vpop.f32.mrb[28].mxu0  ;;  %2150 = vmatmul.mubr.bf16.vlgmr.msra.gmra.mrb[36].mxu1 %v1919_v54  ;;  %2525 = vmatprep.mubr.bf16.mxu0 %v1921_v18 }
 0x99b   :  { %v1914_v31 = vmul.f32 %v1902_v6, %v1814_v42  ;;  %v1816_v22 = vpop.f32.mrb[29].mxu0 }
 0x99c   :  { %v1922_v53 = vpack.c.bf16 %v1916_v36, %v1913_v11  ;;  %v1915_v35 = vmul.f32 %v1903_v17, %v1816_v22  ;;  %v1818_v24 = vpop.f32.mrb[30].mxu0 }
 0x99d   :  { %v1820_v16 = vpop.f32.mrb[31].mxu0 }
 0x99e   :  { %v1918_v37 = vmul.f32 %v1906_v58, %v1820_v16 }
 0x99f   :  { %v2839_v28 = vpop.eup %2838 }
 0x9a0   :  { %v1905_v59 = vmul.f32 %v2839_v28, %v3627_v49  ;;  %v1924_v39 = vpack.c.bf16 %v1918_v37, %v1915_v35 }
 0x9a2   :  { %v1917_v41 = vmul.f32 %v1905_v59, %v1818_v24  ;;  %2526 = vmatmul.mubr.bf16.vlgmr.msra.gmra.mrb[32].mxu0 %v1924_v39 }
 0x9a4   :  { %v1923_v51 = vpack.c.bf16 %v1917_v41, %v1914_v31 }
 0x9a6   :  { %2157 = vmatprep.mubr.bf16.mxu1 %v1923_v51 }
 0x9a7   :  { %2158 = vmatmul.mubr.bf16.gmra.mrb[40].mxu1 %v1922_v53 }
 0xa6d   :  { %v2419_v32 = vpop.f32.mrb[36].mxu1 }
 0xa6e   :  { %v2420_v43 = vpop.f32.mrb[37].mxu1 }
 0xa6f   :  { %v2421_v21 = vadd.f32 %v2420_v43, %v2419_v32  ;;  %v2422_v30 = vpop.f32.mrb[38].mxu1 }
 0xa70   :  { %v2423_v34 = vpop.f32.mrb[39].mxu1 }
 0xa71   :  { %v2424_v19 = vadd.f32 %v2423_v34, %v2422_v30 }
 0xa75   :  { %v2527_v25 = vpop.f32.mrb[32].mxu0 }
 0xa76   :  { %v2200_v44 = vpop.f32.mrb[33].mxu0 }
 0xa77   :  { %v2201_v45 = vadd.f32 %v2421_v21, %v2200_v44  ;;  %v2528_v33 = vpop.f32.mrb[34].mxu0 }
 0xa78   :  { %v2203_v47 = vpop.f32.mrb[35].mxu0 }
 0xa79   :  { %v2215_v46 = vadd.f32 %v2201_v45, %v3561_v55  ;;  %v2204_v49 = vadd.f32 %v2424_v19, %v2203_v47 }
 0xa7a   :  { %v2425_v29 = vpop.f32.mrb[40].mxu1 }
 0xa7b   :  { %v2426_v48 = vpop.f32.mrb[41].mxu1  ;;  %2219 = vst [vmem:[#allocation14] sm:$0xff] %v2215_v46  ;;  %v2216_v52 = vadd.f32 %v2204_v49, %v3565_v20 }
 0xa7c   :  { %v2427_v60 = vadd.f32 %v2426_v48, %v2425_v29  ;;  %v2428_v61 = vpop.f32.mrb[42].mxu1 }
 0xa7d   :  { %v2429_v1 = vpop.f32.mrb[43].mxu1  ;;  %2220 = vst [vmem:[#allocation14 + $0x8] sm:$0xff] %v2216_v52 }
 0xa7e   :  { %v2209_v38 = vadd.f32 %v2527_v25, %v2427_v60  ;;  %v2430_v3 = vadd.f32 %v2429_v1, %v2428_v61 }
 0xa80   :  { %v2217_v9 = vadd.f32 %v2209_v38, %v3563_v57  ;;  %v2212_v63 = vadd.f32 %v2528_v33, %v2430_v3 }
 0xa82   :  { %2221 = vst [vmem:[#allocation14 + $0x10] sm:$0xff] %v2217_v9  ;;  %v2218_v55 = vadd.f32 %v2212_v63, %v3571_v26 }
 0xa84   :  { %2222 = vst [vmem:[#allocation14 + $0x18] sm:$0xff] %v2218_v55 }
 0xa85   :  { %3009 = shalt.err (!%p3006_p4)
}
 0xa86   :  { %s3010_s2 = scalar_lea.hbm %s3678_s11, 512 }
 0xa87   :  { %p3011_p5 = scmp.ne.s32.totalorder %s3678_s11, %s3010_s2  ;;  %p3014_p6 = scmp.lt.u32.totalorder %s3010_s2, %s3678_s11 }
 0xa89   :  { %p3016_p7 = pnand %p3014_p6, %p3011_p5 }
 0xa8b   :  { %3019 = shalt.err (!%p3016_p7)
}
 0xa8c   :  { %2234 = dma.vmem_to_hbm [thread:$0]  %s2229_s12, 512, %s3678_s11, [#allocation4], %s3038_s7, %s3038_s7, %s3039_s15  }
 0xa8d   :  { %3028 = dma.done.wait [#allocation4], 512  }
 0xa8e   :  { %3029 = vsyncadd [#allocation4], 4294966784 }
 0xa8f   :  { %2238 = vsyncpa [#allocation3], 1 }
 0xa90   :  { %2239 = vsyncpa [#allocation6], 1 }
 0xa91   :  { %2240 = vsyncpa [#allocation9], 1 }
 0xa92   :  { %2241 = vsyncpa [#allocation12], 1 }
 0xa93   :  { %2242 = vsyncpa [#allocation4], 1 }

</bundles_post_ra>
